<compile_context>
chip_gen: v5e
topology: v5e:2x2
jax: 0.10.0
libtpu: 0.0.40
codegen_flags: <defaults>
</compile_context>

<pallas_src>
import functools

import jax
import jax.numpy as jnp
from jax.experimental import pallas as pl
from jax.experimental.pallas import tpu as pltpu


def _round_up(n, m):
    return ((n + m - 1) // m) * m


def _num_tensorcores():
    """Best-effort TensorCore-per-chip count (2 on v7x, else 1)."""
    try:
        kind = jax.devices()[0].device_kind.lower()
    except Exception:
        return 1
    return 2 if "v7" in kind else 1


def _pick_batch_tile(B, batch_tile, num_tc):
    bt = _round_up(max(8, batch_tile), 8)
    if num_tc > 1:
        # v7x only: want >= 2 grid steps per TensorCore so each core's output
        # writeback overlaps the next tile's compute.
        cap = _round_up(pl.cdiv(B, 2 * num_tc), 8)
        bt = min(bt, max(8, cap))
    if bt >= B:
        bt = B  # single full-extent block (legal even when B % 8 != 0)
    return bt


def _mlp_kernel(x_ref, w1_ref, b1_ref, w2_ref, b2_ref, w3_ref, b3_ref, out_ref):
    # Matmul operand dtype is driven by the weights (bf16 fast path or f32).
    mx = w1_ref.dtype
    E = w1_ref.shape[1]
    n_out = w3_ref.shape[1]

    x = x_ref[...].astype(mx)

    # fc1 + relu (f32 accumulation, f32 bias/ReLU)
    h1 = jnp.dot(x, w1_ref[...], preferred_element_type=jnp.float32) + b1_ref[...]
    h1 = jnp.maximum(h1, 0.0)

    # fc2 + relu
    h2 = jnp.dot(h1.astype(mx), w2_ref[...],
                 preferred_element_type=jnp.float32) + b2_ref[...]
    h2 = jnp.maximum(h2, 0.0)

    # fc3 (logits)
    logits = jnp.dot(h2.astype(mx), w3_ref[...],
                     preferred_element_type=jnp.float32) + b3_ref[...]

    # softmax over dim=1 (last axis), numerically stable, all f32, per-row only
    # (per-row structure is required for the ragged-last-block path to be safe).
    m = jnp.max(logits, axis=-1, keepdims=True)
    e = jnp.exp(logits - m)
    denom = jnp.sum(e, axis=-1, keepdims=True)
    prob = e * pl.reciprocal(denom, approx=False)

    # Store fc2 | fc3 | prob directly into lane slices of the packed out tile
    # (no concatenate temp). Pad lanes (if any) zeroed once.
    odt = out_ref.dtype
    out_ref[:, :E] = h2.astype(odt)
    out_ref[:, E:E + n_out] = logits.astype(odt)
    out_ref[:, E + n_out:E + 2 * n_out] = prob.astype(odt)
    pad = out_ref.shape[-1] - (E + 2 * n_out)
    if pad > 0:
        out_ref[:, E + 2 * n_out:] = jnp.zeros((out_ref.shape[0], pad), odt)


@functools.partial(
    jax.jit,
    static_argnames=("batch_tile", "use_bf16_matmul", "pad_output_lanes",
                     "bf16_output"))
def classifier_triplet_forward(x, params, batch_tile=8192, use_bf16_matmul=True,
                               pad_output_lanes=True, bf16_output=False):
    """x: (B, n_inputs) float32. params: dict of transposed weights/biases.

    Returns (fc2, fc3, prob) in float32, matching the PyTorch module.
    """
    B, n_inputs = x.shape
    w1, b1 = params["w1"], params["b1"]   # (n_inputs, E), (1, E)
    w2, b2 = params["w2"], params["b2"]   # (E, E),        (1, E)
    w3, b3 = params["w3"], params["b3"]   # (E, n_out),    (1, n_out)
    E = w1.shape[1]
    n_out = w3.shape[1]

    # Packed output width (fc2 | fc3 | prob [| zero pad to 128 lanes]).
    pack_w = _round_up(E + 2 * n_out, 128) if pad_output_lanes else (E + 2 * n_out)

    # Effective batch tile (no wrapper-side padding; Pallas masks the ragged
    # last block).
    bt = _pick_batch_tile(B, batch_tile, _num_tensorcores())
    grid = (pl.cdiv(B, bt),)

    # bf16 MXU operands halve weight DMA bytes; biases stay f32 (added post-MXU).
    mx_dtype = jnp.bfloat16 if use_bf16_matmul else jnp.float32
    w1c = w1.astype(mx_dtype)
    w2c = w2.astype(mx_dtype)
    w3c = w3.astype(mx_dtype)

    out_dtype = jnp.bfloat16 if bf16_output else jnp.float32

    # Conservative scoped-VMEM request (double-buffered x + out tiles + params);
    # 32 MiB covers bt up to ~16k and is within every generation's physical VMEM.
    est = 2 * bt * n_inputs * 4 + 2 * bt * pack_w * jnp.dtype(out_dtype).itemsize
    est += (w1c.size + w2c.size + w3c.size) * w1c.dtype.itemsize + 4 * (2 * E + n_out)
    vmem_limit = int(min(max(2 * est, 32 << 20), 64 << 20))

    # Replicated (full-array) blocks for parameters; batch tiled for x / output.
    rep = lambda shape: pl.BlockSpec(shape, lambda i: (0, 0))

    packed = pl.pallas_call(
        _mlp_kernel,
        out_shape=jax.ShapeDtypeStruct((B, pack_w), out_dtype),
        grid_spec=pltpu.PrefetchScalarGridSpec(
            num_scalar_prefetch=0,
            grid=grid,
            in_specs=[
                pl.BlockSpec((bt, n_inputs), lambda i: (i, 0)),  # x
                rep((n_inputs, E)),   # w1
                rep((1, E)),          # b1
                rep((E, E)),          # w2
                rep((1, E)),          # b2
                rep((E, n_out)),      # w3
                rep((1, n_out)),      # b3
            ],
            out_specs=pl.BlockSpec((bt, pack_w), lambda i: (i, 0)),
        ),
        compiler_params=pltpu.CompilerParams(
            dimension_semantics=("parallel",),
            vmem_limit_bytes=vmem_limit,
        ),
    )(x, w1c, b1, w2c, b2, w3c, b3)

    # NOTE: if the consumer can take the packed layout, return `packed` directly
    # and skip these slice copies (they re-read the dominant output stream).
    fc2 = packed[:, :E]
    fc3 = packed[:, E:E + n_out]
    prob = packed[:, E + n_out:E + 2 * n_out]
    if bf16_output:
        fc2 = fc2.astype(jnp.float32)
        fc3 = fc3.astype(jnp.float32)
        prob = prob.astype(jnp.float32)
    return fc2, fc3, prob


def init_params(key, n_inputs, embed_dim, n_outputs):
    """Deterministic synthetic init (uniform, roughly matching nn.Linear scale).
    Weights are stored already transposed to (in_features, out_features)."""
    k1, k2, k3, k4, k5, k6 = jax.random.split(key, 6)

    def lin(kw, kb, fan_in, fan_out):
        bound = 1.0 / jnp.sqrt(fan_in)
        w = jax.random.uniform(kw, (fan_in, fan_out), jnp.float32, -bound, bound)
        b = jax.random.uniform(kb, (1, fan_out), jnp.float32, -bound, bound)
        return w, b

    w1, b1 = lin(k1, k2, n_inputs, embed_dim)
    w2, b2 = lin(k3, k4, embed_dim, embed_dim)
    w3, b3 = lin(k5, k6, embed_dim, n_outputs)
    return {"w1": w1, "b1": b1, "w2": w2, "b2": b2, "w3": w3, "b3": b3}


def _reference_forward(x, p):
    h1 = jnp.maximum(x @ p["w1"] + p["b1"], 0.0)
    h2 = jnp.maximum(h1 @ p["w2"] + p["b2"], 0.0)
    logits = h2 @ p["w3"] + p["b3"]
    prob = jax.nn.softmax(logits, axis=1)
    return h2, logits, prob


if __name__ == "__main__":
    # Small shapes consistent with the module: n_inputs=32, embed_dim=64,
    # n_outputs=16. B=250 is deliberately not a multiple of 8.
    B, n_inputs, embed_dim, n_outputs = 250, 32, 64, 16

    key = jax.random.PRNGKey(0)
    kx, kp = jax.random.split(key)
    x = jax.random.normal(kx, (B, n_inputs), jnp.float32)
    params = init_params(kp, n_inputs, embed_dim, n_outputs)

    r2, r3, rp = _reference_forward(x, params)

    def check(outs, rtol, atol, tag):
        fc2, fc3, prob = outs
        assert fc2.shape == (B, embed_dim) and fc3.shape == (B, n_outputs)
        assert prob.shape == (B, n_outputs)
        assert jnp.allclose(fc2, r2, rtol=rtol, atol=atol), f"fc2 mismatch ({tag})"
        assert jnp.allclose(fc3, r3, rtol=rtol, atol=atol), f"fc3 mismatch ({tag})"
        assert jnp.allclose(prob, rp, rtol=rtol, atol=atol), f"prob mismatch ({tag})"

    # Exact f32-MXU path, single full-extent block (grid=(1,) on 1-TC chips).
    outs = classifier_triplet_forward(x, params, use_bf16_matmul=False)
    jax.block_until_ready(outs)
    check(outs, rtol=0.0, atol=1e-5, tag="f32, big tile")

    # Exact f32 path with a small forced tile: exercises the ragged last block
    # (250 = 3*64 + 58) and the multi-step batch grid.
    outs = classifier_triplet_forward(x, params, batch_tile=64,
                                      use_bf16_matmul=False)
    jax.block_until_ready(outs)
    check(outs, rtol=0.0, atol=1e-5, tag="f32, ragged grid")

    # Unpadded-lane (pack_w = 96) variant, exact f32 path.
    outs = classifier_triplet_forward(x, params, use_bf16_matmul=False,
                                      pad_output_lanes=False)
    jax.block_until_ready(outs)
    check(outs, rtol=0.0, atol=1e-5, tag="f32, no lane pad")

    # Default fast path: bf16 MXU operands, f32 accumulation / epilogue.
    outs = classifier_triplet_forward(x, params)
    jax.block_until_ready(outs)
    check(outs, rtol=5e-2, atol=5e-2, tag="bf16 matmul")

    # bf16 packed-output path (halved output DMA), loose tolerance.
    outs = classifier_triplet_forward(x, params, bf16_output=True)
    jax.block_until_ready(outs)
    check(outs, rtol=5e-2, atol=5e-2, tag="bf16 matmul + bf16 out")

    print("KERNEL_OK")
</pallas_src>

<mosaic_0001>
module attributes {stable_mosaic.version = 11 : i64} {
  func.func @_mlp_kernel(%arg0: i32, %arg1: memref<250x32xf32, #tpu.memory_space<vmem>>, %arg2: memref<32x64xf32, #tpu.memory_space<vmem>>, %arg3: memref<1x64xf32, #tpu.memory_space<vmem>>, %arg4: memref<64x64xf32, #tpu.memory_space<vmem>>, %arg5: memref<1x64xf32, #tpu.memory_space<vmem>>, %arg6: memref<64x16xf32, #tpu.memory_space<vmem>>, %arg7: memref<1x16xf32, #tpu.memory_space<vmem>>, %arg8: memref<250x128xf32, #tpu.memory_space<vmem>>) attributes {dimension_semantics = [#tpu.dimension_semantics<parallel>], iteration_bounds = array<i64: 1>, scalar_prefetch = 0 : i64, scratch_operands = 0 : i64, tpu.core_type = #tpu.core_type<tc>, window_params = [{transform_indices = @transform_0, window_bounds = array<i64: 250, 32>}, {pipeline_mode = #tpu.pipeline_mode<synchronous>, transform_indices = @transform_1, window_bounds = array<i64: 32, 64>}, {pipeline_mode = #tpu.pipeline_mode<synchronous>, transform_indices = @transform_2, window_bounds = array<i64: 1, 64>}, {pipeline_mode = #tpu.pipeline_mode<synchronous>, transform_indices = @transform_3, window_bounds = array<i64: 64, 64>}, {pipeline_mode = #tpu.pipeline_mode<synchronous>, transform_indices = @transform_4, window_bounds = array<i64: 1, 64>}, {pipeline_mode = #tpu.pipeline_mode<synchronous>, transform_indices = @transform_5, window_bounds = array<i64: 64, 16>}, {pipeline_mode = #tpu.pipeline_mode<synchronous>, transform_indices = @transform_6, window_bounds = array<i64: 1, 16>}, {transform_indices = @transform_7, window_bounds = array<i64: 250, 128>}]} {
    %c0 = arith.constant 0 : index
    %c0_0 = arith.constant 0 : index
    %0 = vector.load %arg1[%c0, %c0_0] : memref<250x32xf32, #tpu.memory_space<vmem>>, vector<250x32xf32>
    %c0_1 = arith.constant 0 : index
    %c0_2 = arith.constant 0 : index
    %1 = vector.load %arg2[%c0_1, %c0_2] : memref<32x64xf32, #tpu.memory_space<vmem>>, vector<32x64xf32>
    %cst = arith.constant dense<0.000000e+00> : vector<250x64xf32>
    %2 = tpu.matmul %0, %1, %cst {dimension_numbers = #tpu.dot_dimension_numbers<[1], [0], [0], [1], [0, 0, 1, 1], [], []>} : vector<250x32xf32>, vector<32x64xf32>, vector<250x64xf32> -> vector<250x64xf32>
    %c0_3 = arith.constant 0 : index
    %c0_4 = arith.constant 0 : index
    %3 = vector.load %arg3[%c0_3, %c0_4] : memref<1x64xf32, #tpu.memory_space<vmem>>, vector<1x64xf32>
    %4 = vector.broadcast %3 : vector<1x64xf32> to vector<250x64xf32>
    %5 = arith.addf %2, %4 : vector<250x64xf32>
    %cst_5 = arith.constant 0.000000e+00 : f32
    %6 = vector.broadcast %cst_5 : f32 to vector<250x64xf32>
    %7 = arith.maximumf %5, %6 : vector<250x64xf32>
    %c0_6 = arith.constant 0 : index
    %c0_7 = arith.constant 0 : index
    %8 = vector.load %arg4[%c0_6, %c0_7] : memref<64x64xf32, #tpu.memory_space<vmem>>, vector<64x64xf32>
    %cst_8 = arith.constant dense<0.000000e+00> : vector<250x64xf32>
    %9 = tpu.matmul %7, %8, %cst_8 {dimension_numbers = #tpu.dot_dimension_numbers<[1], [0], [0], [1], [0, 0, 1, 1], [], []>} : vector<250x64xf32>, vector<64x64xf32>, vector<250x64xf32> -> vector<250x64xf32>
    %c0_9 = arith.constant 0 : index
    %c0_10 = arith.constant 0 : index
    %10 = vector.load %arg5[%c0_9, %c0_10] : memref<1x64xf32, #tpu.memory_space<vmem>>, vector<1x64xf32>
    %11 = vector.broadcast %10 : vector<1x64xf32> to vector<250x64xf32>
    %12 = arith.addf %9, %11 : vector<250x64xf32>
    %cst_11 = arith.constant 0.000000e+00 : f32
    %13 = vector.broadcast %cst_11 : f32 to vector<250x64xf32>
    %14 = arith.maximumf %12, %13 : vector<250x64xf32>
    %c0_12 = arith.constant 0 : index
    %c0_13 = arith.constant 0 : index
    %15 = vector.load %arg6[%c0_12, %c0_13] : memref<64x16xf32, #tpu.memory_space<vmem>>, vector<64x16xf32>
    %cst_14 = arith.constant dense<0.000000e+00> : vector<250x16xf32>
    %16 = tpu.matmul %14, %15, %cst_14 {dimension_numbers = #tpu.dot_dimension_numbers<[1], [0], [0], [1], [0, 0, 1, 1], [], []>} : vector<250x64xf32>, vector<64x16xf32>, vector<250x16xf32> -> vector<250x16xf32>
    %c0_15 = arith.constant 0 : index
    %c0_16 = arith.constant 0 : index
    %17 = vector.load %arg7[%c0_15, %c0_16] : memref<1x16xf32, #tpu.memory_space<vmem>>, vector<1x16xf32>
    %18 = vector.broadcast %17 : vector<1x16xf32> to vector<250x16xf32>
    %19 = arith.addf %16, %18 : vector<250x16xf32>
    %cst_17 = arith.constant dense<0xFF800000> : vector<250xf32>
    %20 = vector.multi_reduction <maximumf>, %19, %cst_17 [1] : vector<250x16xf32> to vector<250xf32>
    %21 = vector.shape_cast %20 : vector<250xf32> to vector<250x1xf32>
    %22 = vector.broadcast %21 : vector<250x1xf32> to vector<250x16xf32>
    %23 = arith.subf %19, %22 : vector<250x16xf32>
    %24 = math.exp %23 : vector<250x16xf32>
    %cst_18 = arith.constant dense<0.000000e+00> : vector<250xf32>
    %25 = vector.multi_reduction <add>, %24, %cst_18 [1] : vector<250x16xf32> to vector<250xf32>
    %26 = vector.shape_cast %25 : vector<250xf32> to vector<250x1xf32>
    %27 = tpu.reciprocal %26 : vector<250x1xf32> -> vector<250x1xf32>
    %28 = vector.broadcast %27 : vector<250x1xf32> to vector<250x16xf32>
    %29 = arith.mulf %24, %28 : vector<250x16xf32>
    %c0_19 = arith.constant 0 : index
    %c0_20 = arith.constant 0 : index
    %30 = vector.load %arg8[%c0_19, %c0_20] : memref<250x128xf32, #tpu.memory_space<vmem>>, vector<250x64xf32>
    tpu.vector_store %arg8[%c0_19, %c0_20], %14 {strides = array<i32>} : memref<250x128xf32, #tpu.memory_space<vmem>>, vector<250x64xf32>,
    %c0_21 = arith.constant 0 : index
    %c64 = arith.constant 64 : index
    %31 = vector.load %arg8[%c0_21, %c64] : memref<250x128xf32, #tpu.memory_space<vmem>>, vector<250x16xf32>
    tpu.vector_store %arg8[%c0_21, %c64], %19 {strides = array<i32>} : memref<250x128xf32, #tpu.memory_space<vmem>>, vector<250x16xf32>,
    %c0_22 = arith.constant 0 : index
    %c80 = arith.constant 80 : index
    %32 = vector.load %arg8[%c0_22, %c80] : memref<250x128xf32, #tpu.memory_space<vmem>>, vector<250x16xf32>
    tpu.vector_store %arg8[%c0_22, %c80], %29 {strides = array<i32>} : memref<250x128xf32, #tpu.memory_space<vmem>>, vector<250x16xf32>,
    %cst_23 = arith.constant 0.000000e+00 : f32
    %33 = vector.broadcast %cst_23 : f32 to vector<250x32xf32>
    %c0_24 = arith.constant 0 : index
    %c96 = arith.constant 96 : index
    %34 = vector.load %arg8[%c0_24, %c96] : memref<250x128xf32, #tpu.memory_space<vmem>>, vector<250x32xf32>
    tpu.vector_store %arg8[%c0_24, %c96], %33 {strides = array<i32>} : memref<250x128xf32, #tpu.memory_space<vmem>>, vector<250x32xf32>,
    return
  }
  func.func @transform_0(%arg0: i32) -> (i32, i32) {
    %c0_i32 = arith.constant 0 : i32
    %c0_i32_0 = arith.constant 0 : i32
    return %arg0, %c0_i32 : i32, i32
  }
  func.func @transform_1(%arg0: i32) -> (i32, i32) {
    %c0_i32 = arith.constant 0 : i32
    %c0_i32_0 = arith.constant 0 : i32
    %c0_i32_1 = arith.constant 0 : i32
    return %c0_i32, %c0_i32_0 : i32, i32
  }
  func.func @transform_2(%arg0: i32) -> (i32, i32) {
    %c0_i32 = arith.constant 0 : i32
    %c0_i32_0 = arith.constant 0 : i32
    %c0_i32_1 = arith.constant 0 : i32
    return %c0_i32, %c0_i32_0 : i32, i32
  }
  func.func @transform_3(%arg0: i32) -> (i32, i32) {
    %c0_i32 = arith.constant 0 : i32
    %c0_i32_0 = arith.constant 0 : i32
    %c0_i32_1 = arith.constant 0 : i32
    return %c0_i32, %c0_i32_0 : i32, i32
  }
  func.func @transform_4(%arg0: i32) -> (i32, i32) {
    %c0_i32 = arith.constant 0 : i32
    %c0_i32_0 = arith.constant 0 : i32
    %c0_i32_1 = arith.constant 0 : i32
    return %c0_i32, %c0_i32_0 : i32, i32
  }
  func.func @transform_5(%arg0: i32) -> (i32, i32) {
    %c0_i32 = arith.constant 0 : i32
    %c0_i32_0 = arith.constant 0 : i32
    %c0_i32_1 = arith.constant 0 : i32
    return %c0_i32, %c0_i32_0 : i32, i32
  }
  func.func @transform_6(%arg0: i32) -> (i32, i32) {
    %c0_i32 = arith.constant 0 : i32
    %c0_i32_0 = arith.constant 0 : i32
    %c0_i32_1 = arith.constant 0 : i32
    return %c0_i32, %c0_i32_0 : i32, i32
  }
  func.func @transform_7(%arg0: i32) -> (i32, i32) {
    %c0_i32 = arith.constant 0 : i32
    %c0_i32_0 = arith.constant 0 : i32
    return %arg0, %c0_i32 : i32, i32
  }
}

</mosaic_0001>

<bundles_post_ra>
// kernel: classifier_triplet_forward.1
= control target key start
LH: loop header
LB: loop body
LE: loop exit
PB: predicated region body
PF: predicated region fallthrough
CT: control target
= control target key end

     0   :  { %vm66_vm0 = vcmask 261120   ;;  %vm320_vm1 = vcmask 523264   ;;  %vm783_vm2 = vcmask 130048   ;;  %s2199_s13 = smov 64   ;;  %vm1714_vm3 = vcmask 654848   ;;  %s2200_s12 = smov 80   ;;  %s3893_s1 = inlined_call_operand.vmem [shape: f32[32,64], index: 1, kind: input, shape index: {}]   ;;  %s3894_s0 = inlined_call_operand.vmem [shape: f32[250,32], index: 0, kind: input, shape index: {}]   ;;  %s3895_s2 = inlined_call_operand.vmem [shape: f32[1,64], index: 2, kind: input, shape index: {}]   ;;  %s3896_s3 = inlined_call_operand.vmem [shape: f32[64,64], index: 3, kind: input, shape index: {}]   ;;  %s3897_s4 = inlined_call_operand.vmem [shape: f32[1,64], index: 4, kind: input, shape index: {}]   ;;  %s3898_s5 = inlined_call_operand.vmem [shape: f32[64,16], index: 5, kind: input, shape index: {}]   ;;  %s3899_s6 = inlined_call_operand.vmem [shape: f32[1,16], index: 6, kind: input, shape index: {}]   ;;  %s3900_s7 = inlined_call_operand.vmem [shape: f32[250,128], index: 7, kind: output, shape index: {}]  }
   0x1   :  { %v61_v0 = vld [vmem:[%s3893_s1 + $0x18] sm:$0xff]  ;;  %v60_v1 = vld [vmem:[%s3893_s1 + $0x10] sm:$0xff]  ;;  %v59_v2 = vld [vmem:[%s3893_s1 + $0x8] sm:$0xff]  ;;  %vm1584_vm4 = vcmask 517120   ;;  %vm877_vm10 = vcmask 123904  }
   0x2   :  { %175 = vmatpush.msra.mxu0 %v61_v0  ;;  %2044 = vmatpush.msra.mxu3 %v61_v0  ;;  %v58_v3 = vld [vmem:[%s3893_s1] sm:$0xff]  ;;  %v27_v5 = vld [vmem:[%s3894_s0 + $0x8] sm:$0xff]  ;;  %v28_v6 = vld [vmem:[%s3894_s0 + $0x10] sm:$0xff] }
   0x3   :  { %v26_v4 = vld [vmem:[%s3894_s0] sm:$0xff]  ;;  %v29_v7 = vld [vmem:[%s3894_s0 + $0x18] sm:$0xff]  ;;  %v314_v10 = vld [vmem:[%s3896_s3 + $0x30] sm:$0xff] }
   0x4   :  { %176 = vmatpush.msra.mxu0 %v60_v1  ;;  %2045 = vmatpush.msra.mxu3 %v60_v1  ;;  %v30_v8 = vld [vmem:[%s3894_s0 + $0x20] sm:$0xff]  ;;  %v315_v9 = vld [vmem:[%s3896_s3 + $0x38] sm:$0xff]  ;;  %v313_v11 = vld [vmem:[%s3896_s3 + $0x28] sm:$0xff] }
   0x5   :  { %425 = vmatpush.msra.mxu1 %v315_v9  ;;  %v312_v12 = vld [vmem:[%s3896_s3 + $0x20] sm:$0xff]  ;;  %v31_v13 = vld [vmem:[%s3894_s0 + $0x28] sm:$0xff]  ;;  %v311_v14 = vld [vmem:[%s3896_s3 + $0x18] sm:$0xff] }
   0x6   :  { %177 = vmatpush.msra.mxu0 %v59_v2  ;;  %2046 = vmatpush.msra.mxu3 %v59_v2  ;;  %v32_v15 = vld [vmem:[%s3894_s0 + $0x30] sm:$0xff]  ;;  %v33_v16 = vld [vmem:[%s3894_s0 + $0x38] sm:$0xff]  ;;  %v34_v17 = vld [vmem:[%s3894_s0 + $0x40] sm:$0xff] }
   0x7   :  { %426 = vmatpush.msra.mxu1 %v314_v10  ;;  %v310_v18 = vld [vmem:[%s3896_s3 + $0x10] sm:$0xff]  ;;  %v309_v19 = vld [vmem:[%s3896_s3 + $0x8] sm:$0xff]  ;;  %v308_v20 = vld [vmem:[%s3896_s3] sm:$0xff] }
   0x8   :  { %178 = vmatpush.msra.mxu0 %v58_v3  ;;  %2047 = vmatpush.msra.mxu3 %v58_v3  ;;  %v35_v21 = vld [vmem:[%s3894_s0 + $0x48] sm:$0xff]  ;;  %v36_v22 = vld [vmem:[%s3894_s0 + $0x50] sm:$0xff]  ;;  %v2325_v23 = vld [vmem:[%s3895_s2] ss:$0 sm:$0xff] }
   0x9   :  { %1948 = vmatmul.msk.f32.vlgmr.msra.gmra.mxu0 %vm66_vm0, %v26_v4  ;;  %427 = vmatpush.msra.mxu1 %v313_v11  ;;  %v37_v27 = vld [vmem:[%s3894_s0 + $0x58] sm:$0xff]  ;;  %v38_v34 = vld [vmem:[%s3894_s0 + $0x60] sm:$0xff]  ;;  %v39_v38 = vld [vmem:[%s3894_s0 + $0x68] sm:$0xff] }
   0xa   :  { %2048 = vmatpush.msrb.mxu3 %v315_v9  ;;  %v40_v42 = vld [vmem:[%s3894_s0 + $0x70] sm:$0xff]  ;;  %v2355_v43 = vld [vmem:[%s3898_s5 + $0x38] sm:$0xff]  ;;  %v2367_v45 = vld [vmem:[%s3898_s5 + $0x28] sm:$0xff] }
   0xb   :  { %428 = vmatpush.msra.mxu1 %v312_v12  ;;  %v2360_v44 = vld [vmem:[%s3898_s5 + $0x30] sm:$0xff]  ;;  %678 = vmatpush.msra.mxu2 %v2355_v43  ;;  %v2374_v48 = vld [vmem:[%s3898_s5 + $0x20] sm:$0xff]  ;;  %v2380_v50 = vld [vmem:[%s3898_s5 + $0x18] sm:$0xff] }
   0xc   :  { %2049 = vmatpush.msrb.mxu3 %v314_v10  ;;  %v2394_v60 = vld [vmem:[%s3898_s5 + $0x10] sm:$0xff]  ;;  %v2400_v61 = vld [vmem:[%s3898_s5 + $0x8] sm:$0xff]  ;;  %v2406_v62 = vld [vmem:[%s3898_s5] sm:$0xff] }
   0xd   :  { %429 = vmatpush.msra.mxu1 %v311_v14  ;;  %679 = vmatpush.msra.mxu2 %v2360_v44  ;;  %v41_v63 = vld [vmem:[%s3894_s0 + $0x78] sm:$0xff]  ;;  %v43_v9 = vld [vmem:[%s3894_s0 + $0x88] sm:$0xff] }
   0xe   :  { %2050 = vmatpush.msrb.mxu3 %v313_v11 }
   0xf   :  { %430 = vmatpush.msra.mxu1 %v310_v18  ;;  %680 = vmatpush.msra.mxu2 %v2367_v45 }
  0x10   :  { %2051 = vmatpush.msrb.mxu3 %v312_v12 }
  0x11   :  { %1949 = vmatmul.msk.f32.gmra.mxu0 %vm66_vm0, %v27_v5  ;;  %431 = vmatpush.msra.mxu1 %v309_v19 }
  0x12   :  { %2052 = vmatpush.msrb.mxu3 %v311_v14  ;;  %681 = vmatpush.msra.mxu2 %v2374_v48 }
  0x13   :  { %432 = vmatpush.msra.mxu1 %v308_v20 }
  0x14   :  { %2053 = vmatpush.msrb.mxu3 %v310_v18  ;;  %682 = vmatpush.msra.mxu2 %v2380_v50 }
  0x16   :  { %2054 = vmatpush.msrb.mxu3 %v309_v19  ;;  %683 = vmatpush.msra.mxu2 %v2394_v60 }
  0x18   :  { %2055 = vmatpush.msrb.mxu3 %v308_v20  ;;  %684 = vmatpush.msra.mxu2 %v2400_v61 }
  0x19   :  { %1950 = vmatmul.msk.f32.gmra.mxu0 %vm66_vm0, %v28_v6  ;;  %v42_v6 = vld [vmem:[%s3894_s0 + $0x80] sm:$0xff] }
  0x1a   :  { %685 = vmatpush.msra.mxu2 %v2406_v62 }
  0x21   :  { %1951 = vmatmul.msk.f32.gmra.mxu0 %vm66_vm0, %v29_v7  ;;  %v2424_v7 = vld [vmem:[%s3897_s4] ss:$0 sm:$0xff] }
  0x29   :  { %1952 = vmatmul.msk.f32.gmra.mxu0 %vm66_vm0, %v30_v8 }
  0x31   :  { %1953 = vmatmul.msk.f32.gmra.mxu0 %vm66_vm0, %v31_v13 }
  0x39   :  { %1954 = vmatmul.msk.f32.gmra.mxu0 %vm66_vm0, %v32_v15 }
  0x41   :  { %1955 = vmatmul.msk.f32.gmra.mxu0 %vm66_vm0, %v33_v16 }
  0x49   :  { %1956 = vmatmul.msk.f32.gmra.mxu0 %vm66_vm0, %v34_v17 }
  0x51   :  { %1957 = vmatmul.msk.f32.gmra.mxu0 %vm66_vm0, %v35_v21 }
  0x59   :  { %1958 = vmatmul.msk.f32.gmra.mxu0 %vm66_vm0, %v36_v22 }
  0x61   :  { %1959 = vmatmul.msk.f32.gmra.mxu0 %vm66_vm0, %v37_v27 }
  0x69   :  { %1960 = vmatmul.msk.f32.gmra.mxu0 %vm66_vm0, %v38_v34 }
  0x71   :  { %1961 = vmatmul.msk.f32.gmra.mxu0 %vm66_vm0, %v39_v38 }
  0x79   :  { %1962 = vmatmul.msk.f32.gmra.mxu0 %vm66_vm0, %v40_v42 }
  0x81   :  { %1963 = vmatmul.msk.f32.gmra.mxu0 %vm66_vm0, %v41_v63 }
  0x86   :  { %v180_v24 = vpop.f32.mrf.mxu0 }
  0x87   :  { %v181_v25 = vadd.f32 %v2325_v23, %v180_v24 }
  0x89   :  { %v276_v26 = vmax.f32 %v181_v25, 0.0  ;;  %1964 = vmatmul.msk.f32.gmra.mxu0 %vm66_vm0, %v42_v6  ;;  %v44_v25 = vld [vmem:[%s3894_s0 + $0x90] sm:$0xff] }
  0x8b   :  { %1980 = vmatmul.msk.f32.vlgmr.msra.gmra.mxu1 %vm320_vm1, %v276_v26 }
  0x8e   :  { %v183_v28 = vpop.f32.mrf.mxu0 }
  0x8f   :  { %v184_v29 = vadd.f32 %v2325_v23, %v183_v28 }
  0x91   :  { %v277_v30 = vmax.f32 %v184_v29, 0.0  ;;  %1965 = vmatmul.msk.f32.gmra.mxu0 %vm66_vm0, %v43_v9 }
  0x93   :  { %1981 = vmatmul.msk.f32.gmra.mxu1 %vm320_vm1, %v277_v30  ;;  %v45_v30 = vld [vmem:[%s3894_s0 + $0x98] sm:$0xff] }
  0x96   :  { %v186_v31 = vpop.f32.mrf.mxu0 }
  0x97   :  { %v187_v32 = vadd.f32 %v2325_v23, %v186_v31 }
  0x99   :  { %v278_v33 = vmax.f32 %v187_v32, 0.0  ;;  %1966 = vmatmul.msk.f32.gmra.mxu0 %vm66_vm0, %v44_v25 }
  0x9b   :  { %1982 = vmatmul.msk.f32.gmra.mxu1 %vm320_vm1, %v278_v33 }
  0x9e   :  { %v189_v35 = vpop.f32.mrf.mxu0 }
  0x9f   :  { %v190_v36 = vadd.f32 %v2325_v23, %v189_v35 }
  0xa1   :  { %v279_v37 = vmax.f32 %v190_v36, 0.0  ;;  %1967 = vmatmul.msk.f32.gmra.mxu0 %vm66_vm0, %v45_v30 }
  0xa3   :  { %1983 = vmatmul.msk.f32.gmra.mxu1 %vm320_vm1, %v279_v37  ;;  %v46_v37 = vld [vmem:[%s3894_s0 + $0xa0] sm:$0xff] }
  0xa6   :  { %v192_v39 = vpop.f32.mrf.mxu0 }
  0xa7   :  { %v193_v40 = vadd.f32 %v2325_v23, %v192_v39 }
  0xa9   :  { %v280_v41 = vmax.f32 %v193_v40, 0.0  ;;  %1968 = vmatmul.msk.f32.gmra.mxu0 %vm66_vm0, %v46_v37 }
  0xab   :  { %1984 = vmatmul.msk.f32.gmra.mxu1 %vm320_vm1, %v280_v41 }
  0xae   :  { %v195_v46 = vpop.f32.mrf.mxu0 }
  0xaf   :  { %v196_v47 = vadd.f32 %v2325_v23, %v195_v46 }
  0xb1   :  { %v281_v49 = vmax.f32 %v196_v47, 0.0 }
  0xb3   :  { %1985 = vmatmul.msk.f32.gmra.mxu1 %vm320_vm1, %v281_v49 }
  0xb6   :  { %v198_v51 = vpop.f32.mrf.mxu0 }
  0xb7   :  { %v199_v52 = vadd.f32 %v2325_v23, %v198_v51 }
  0xb9   :  { %v282_v53 = vmax.f32 %v199_v52, 0.0 }
  0xbb   :  { %1986 = vmatmul.msk.f32.gmra.mxu1 %vm320_vm1, %v282_v53 }
  0xbe   :  { %v201_v54 = vpop.f32.mrf.mxu0 }
  0xbf   :  { %v202_v55 = vadd.f32 %v2325_v23, %v201_v54 }
  0xc1   :  { %v283_v56 = vmax.f32 %v202_v55, 0.0 }
  0xc3   :  { %1987 = vmatmul.msk.f32.gmra.mxu1 %vm320_vm1, %v283_v56 }
  0xc6   :  { %v204_v57 = vpop.f32.mrf.mxu0 }
  0xc7   :  { %v205_v58 = vadd.f32 %v2325_v23, %v204_v57 }
  0xc9   :  { %v284_v59 = vmax.f32 %v205_v58, 0.0 }
  0xcb   :  { %1988 = vmatmul.msk.f32.gmra.mxu1 %vm320_vm1, %v284_v59 }
  0xce   :  { %v207_v0 = vpop.f32.mrf.mxu0 }
  0xcf   :  { %v208_v1 = vadd.f32 %v2325_v23, %v207_v0 }
  0xd1   :  { %v285_v2 = vmax.f32 %v208_v1, 0.0 }
  0xd3   :  { %1989 = vmatmul.msk.f32.gmra.mxu1 %vm320_vm1, %v285_v2  ;;  %v47_v2 = vld [vmem:[%s3894_s0 + $0xa8] sm:$0xff] }
  0xd4   :  { %1969 = vmatmul.msk.f32.gmra.mxu0 %vm66_vm0, %v47_v2 }
  0xd6   :  { %v210_v3 = vpop.f32.mrf.mxu0 }
  0xd7   :  { %v211_v4 = vadd.f32 %v2325_v23, %v210_v3 }
  0xd9   :  { %v286_v5 = vmax.f32 %v211_v4, 0.0 }
  0xdb   :  { %1990 = vmatmul.msk.f32.gmra.mxu1 %vm320_vm1, %v286_v5 }
  0xde   :  { %v213_v11 = vpop.f32.mrf.mxu0 }
  0xdf   :  { %v214_v13 = vadd.f32 %v2325_v23, %v213_v11 }
  0xe1   :  { %v287_v14 = vmax.f32 %v214_v13, 0.0  ;;  %v48_v13 = vld [vmem:[%s3894_s0 + $0xb0] sm:$0xff] }
  0xe2   :  { %1970 = vmatmul.msk.f32.gmra.mxu0 %vm66_vm0, %v48_v13 }
  0xe3   :  { %1991 = vmatmul.msk.f32.gmra.mxu1 %vm320_vm1, %v287_v14 }
  0xe6   :  { %v216_v18 = vpop.f32.mrf.mxu0 }
  0xe7   :  { %v217_v20 = vadd.f32 %v2325_v23, %v216_v18 }
  0xe9   :  { %v288_v22 = vmax.f32 %v217_v20, 0.0  ;;  %v49_v20 = vld [vmem:[%s3894_s0 + $0xb8] sm:$0xff] }
  0xea   :  { %1971 = vmatmul.msk.f32.gmra.mxu0 %vm66_vm0, %v49_v20 }
  0xeb   :  { %1992 = vmatmul.msk.f32.gmra.mxu1 %vm320_vm1, %v288_v22 }
  0xee   :  { %v219_v29 = vpop.f32.mrf.mxu0 }
  0xef   :  { %v220_v31 = vadd.f32 %v2325_v23, %v219_v29 }
  0xf1   :  { %v289_v33 = vmax.f32 %v220_v31, 0.0 }
  0xf3   :  { %1993 = vmatmul.msk.f32.gmra.mxu1 %vm320_vm1, %v289_v33 }
  0xf6   :  { %v222_v36 = vpop.f32.mrf.mxu0 }
  0xf7   :  { %v223_v38 = vadd.f32 %v2325_v23, %v222_v36 }
  0xf9   :  { %v290_v40 = vmax.f32 %v223_v38, 0.0 }
  0xfb   :  { %1994 = vmatmul.msk.f32.gmra.mxu1 %vm320_vm1, %v290_v40  ;;  %v50_v40 = vld [vmem:[%s3894_s0 + $0xc0] sm:$0xff] }
  0xfc   :  { %1972 = vmatmul.msk.f32.gmra.mxu0 %vm66_vm0, %v50_v40 }
  0xfe   :  { %v225_v57 = vpop.f32.mrf.mxu0 }
  0xff   :  { %v226_v58 = vadd.f32 %v2325_v23, %v225_v57 }
 0x101   :  { %v291_v59 = vmax.f32 %v226_v58, 0.0 }
 0x103   :  { %1995 = vmatmul.msk.f32.gmra.mxu1 %vm320_vm1, %v291_v59 }
 0x106   :  { %v228_v3 = vpop.f32.mrf.mxu0 }
 0x107   :  { %v229_v5 = vadd.f32 %v2325_v23, %v228_v3 }
 0x108   :  { %v434_v8 = vpop.f32.mrf.mxu1 }
 0x109   :  { %v435_v10 = vadd.f32 %v2424_v7, %v434_v8  ;;  %v292_v8 = vmax.f32 %v229_v5, 0.0 }
 0x10b   :  { %v530_v12 = vmax.f32 %v435_v10, 0.0  ;;  %1996 = vmatmul.msk.f32.gmra.mxu1 %vm320_vm1, %v292_v8 }
 0x10d   :  { %1553 = vst.msk [vmem:[%s3900_s7] sm:$0xff] %vm320_vm1, %v530_v12  ;;  %2012 = vmatmul.msk.f32.vlgmr.msra.gmra.mxu2 %vm320_vm1, %v530_v12 }
 0x10e   :  { %v231_v10 = vpop.f32.mrf.mxu0 }
 0x10f   :  { %v232_v11 = vadd.f32 %v2325_v23, %v231_v10  ;;  %v53_v10 = vld [vmem:[%s3894_s0 + $0xd8] sm:$0xff] }
 0x110   :  { %v437_v15 = vpop.f32.mrf.mxu1 }
 0x111   :  { %v438_v16 = vadd.f32 %v2424_v7, %v437_v15  ;;  %v293_v12 = vmax.f32 %v232_v11, 0.0  ;;  %v2533_v15 = vld [vmem:[%s3899_s6] ss:$0 sm:$0xff] }
 0x113   :  { %v531_v17 = vmax.f32 %v438_v16, 0.0  ;;  %1997 = vmatmul.msk.f32.gmra.mxu1 %vm320_vm1, %v293_v12 }
 0x115   :  { %1554 = vst.msk [vmem:[%s3900_s7 + $0x8] sm:$0xff] %vm320_vm1, %v531_v17  ;;  %2013 = vmatmul.msk.f32.gmra.mxu2 %vm320_vm1, %v531_v17 }
 0x118   :  { %v440_v19 = vpop.f32.mrf.mxu1 }
 0x119   :  { %v441_v21 = vadd.f32 %v2424_v7, %v440_v19 }
 0x11b   :  { %v532_v24 = vmax.f32 %v441_v21, 0.0 }
 0x11d   :  { %1555 = vst.msk [vmem:[%s3900_s7 + $0x10] sm:$0xff] %vm320_vm1, %v532_v24  ;;  %2014 = vmatmul.msk.f32.gmra.mxu2 %vm320_vm1, %v532_v24 }
 0x120   :  { %v443_v26 = vpop.f32.mrf.mxu1 }
 0x121   :  { %v444_v27 = vadd.f32 %v2424_v7, %v443_v26 }
 0x123   :  { %v533_v28 = vmax.f32 %v444_v27, 0.0 }
 0x125   :  { %1556 = vst.msk [vmem:[%s3900_s7 + $0x18] sm:$0xff] %vm320_vm1, %v533_v28  ;;  %2015 = vmatmul.msk.f32.gmra.mxu2 %vm320_vm1, %v533_v28 }
 0x128   :  { %v446_v32 = vpop.f32.mrf.mxu1 }
 0x129   :  { %v447_v34 = vadd.f32 %v2424_v7, %v446_v32  ;;  %v234_v32 = vpop.f32.mrf.mxu0 }
 0x12b   :  { %v534_v35 = vmax.f32 %v447_v34, 0.0  ;;  %v235_v34 = vadd.f32 %v2325_v23, %v234_v32  ;;  %v54_v32 = vld [vmem:[%s3894_s0 + $0xe0] sm:$0xff] }
 0x12d   :  { %1557 = vst.msk [vmem:[%s3900_s7 + $0x20] sm:$0xff] %vm320_vm1, %v534_v35  ;;  %2016 = vmatmul.msk.f32.gmra.mxu2 %vm320_vm1, %v534_v35  ;;  %v294_v36 = vmax.f32 %v235_v34, 0.0 }
 0x12f   :  { %1998 = vmatmul.msk.f32.gmra.mxu1 %vm320_vm1, %v294_v36 }
 0x130   :  { %v449_v39 = vpop.f32.mrf.mxu1 }
 0x131   :  { %v450_v41 = vadd.f32 %v2424_v7, %v449_v39 }
 0x133   :  { %v535_v42 = vmax.f32 %v450_v41, 0.0 }
 0x135   :  { %1558 = vst.msk [vmem:[%s3900_s7 + $0x28] sm:$0xff] %vm320_vm1, %v535_v42  ;;  %2017 = vmatmul.msk.f32.gmra.mxu2 %vm320_vm1, %v535_v42  ;;  %v237_v42 = vpop.f32.mrf.mxu0 }
 0x138   :  { %v452_v46 = vpop.f32.mrf.mxu1 }
 0x139   :  { %v453_v47 = vadd.f32 %v2424_v7, %v452_v46 }
 0x13b   :  { %v536_v49 = vmax.f32 %v453_v47, 0.0  ;;  %v238_v47 = vadd.f32 %v2325_v23, %v237_v42 }
 0x13d   :  { %1559 = vst.msk [vmem:[%s3900_s7 + $0x30] sm:$0xff] %vm320_vm1, %v536_v49  ;;  %2018 = vmatmul.msk.f32.gmra.mxu2 %vm320_vm1, %v536_v49 }
 0x140   :  { %v455_v51 = vpop.f32.mrf.mxu1 }
 0x141   :  { %v456_v52 = vadd.f32 %v2424_v7, %v455_v51  ;;  %v295_v51 = vmax.f32 %v238_v47, 0.0 }
 0x143   :  { %v537_v53 = vmax.f32 %v456_v52, 0.0  ;;  %1999 = vmatmul.msk.f32.gmra.mxu1 %vm320_vm1, %v295_v51  ;;  %v56_v51 = vld [vmem:[%s3894_s0 + $0xf0] sm:$0xff] }
 0x145   :  { %1560 = vst.msk [vmem:[%s3900_s7 + $0x38] sm:$0xff] %vm320_vm1, %v537_v53  ;;  %2019 = vmatmul.msk.f32.gmra.mxu2 %vm320_vm1, %v537_v53 }
 0x148   :  { %v458_v54 = vpop.f32.mrf.mxu1 }
 0x149   :  { %v459_v55 = vadd.f32 %v2424_v7, %v458_v54  ;;  %v240_v54 = vpop.f32.mrf.mxu0 }
 0x14a   :  { %v241_v57 = vadd.f32 %v2325_v23, %v240_v54  ;;  %v57_v54 = vld [vmem:[%s3894_s0 + $0xf8] sm:$0x3] }
 0x14b   :  { %v538_v56 = vmax.f32 %v459_v55, 0.0  ;;  %v51_v55 = vld [vmem:[%s3894_s0 + $0xc8] sm:$0xff] }
 0x14c   :  { %1973 = vmatmul.msk.f32.vlgmr.msra.gmra.mxu3 %vm66_vm0, %v51_v55  ;;  %v296_v59 = vmax.f32 %v241_v57, 0.0 }
 0x14d   :  { %1561 = vst.msk [vmem:[%s3900_s7 + $0x40] sm:$0xff] %vm320_vm1, %v538_v56  ;;  %2020 = vmatmul.msk.f32.gmra.mxu2 %vm320_vm1, %v538_v56  ;;  %2056 = vmatpush.msra.mxu3 %v2355_v43 }
 0x14e   :  { %2000 = vmatmul.msk.f32.gmra.mxu1 %vm320_vm1, %v296_v59 }
 0x14f   :  { %2057 = vmatpush.msra.mxu3 %v2360_v44 }
 0x150   :  { %v461_v63 = vpop.f32.mrf.mxu1 }
 0x151   :  { %v462_v0 = vadd.f32 %v2424_v7, %v461_v63  ;;  %2058 = vmatpush.msra.mxu3 %v2367_v45  ;;  %v52_v45 = vld [vmem:[%s3894_s0 + $0xd0] sm:$0xff] }
 0x153   :  { %v539_v1 = vmax.f32 %v462_v0, 0.0  ;;  %2059 = vmatpush.msra.mxu3 %v2374_v48 }
 0x154   :  { %1974 = vmatmul.msk.f32.gmra.mxu3 %vm66_vm0, %v52_v45 }
 0x155   :  { %1562 = vst.msk [vmem:[%s3900_s7 + $0x48] sm:$0xff] %vm320_vm1, %v539_v1  ;;  %2021 = vmatmul.msk.f32.gmra.mxu2 %vm320_vm1, %v539_v1  ;;  %2060 = vmatpush.msra.mxu3 %v2380_v50 }
 0x157   :  { %2061 = vmatpush.msra.mxu3 %v2394_v60 }
 0x158   :  { %v464_v4 = vpop.f32.mrf.mxu1 }
 0x159   :  { %v465_v6 = vadd.f32 %v2424_v7, %v464_v4  ;;  %2062 = vmatpush.msra.mxu3 %v2400_v61 }
 0x15b   :  { %v540_v9 = vmax.f32 %v465_v6, 0.0  ;;  %2063 = vmatpush.msra.mxu3 %v2406_v62  ;;  %v243_v6 = vpop.f32.mrf.mxu0 }
 0x15c   :  { %v244_v8 = vadd.f32 %v2325_v23, %v243_v6  ;;  %1975 = vmatmul.msk.f32.gmra.mxu3 %vm66_vm0, %v53_v10 }
 0x15d   :  { %1563 = vst.msk [vmem:[%s3900_s7 + $0x50] sm:$0xff] %vm320_vm1, %v540_v9  ;;  %2022 = vmatmul.msk.f32.gmra.mxu2 %vm320_vm1, %v540_v9 }
 0x15e   :  { %v297_v9 = vmax.f32 %v244_v8, 0.0 }
 0x160   :  { %v467_v14 = vpop.f32.mrf.mxu1  ;;  %2001 = vmatmul.msk.f32.gmra.mxu1 %vm320_vm1, %v297_v9 }
 0x161   :  { %v468_v16 = vadd.f32 %v2424_v7, %v467_v14 }
 0x163   :  { %v541_v17 = vmax.f32 %v468_v16, 0.0  ;;  %v246_v20 = vpop.f32.mrf.mxu0 }
 0x164   :  { %1976 = vmatmul.msk.f32.gmra.mxu3 %vm66_vm0, %v54_v32 }
 0x165   :  { %1564 = vst.msk [vmem:[%s3900_s7 + $0x58] sm:$0xff] %vm320_vm1, %v541_v17  ;;  %2023 = vmatmul.msk.f32.gmra.mxu2 %vm320_vm1, %v541_v17 }
 0x168   :  { %v470_v31 = vpop.f32.mrf.mxu1 }
 0x169   :  { %v471_v33 = vadd.f32 %v2424_v7, %v470_v31 }
 0x16b   :  { %v542_v35 = vmax.f32 %v471_v33, 0.0 }
 0x16d   :  { %1565 = vst.msk [vmem:[%s3900_s7 + $0x60] sm:$0xff] %vm320_vm1, %v542_v35  ;;  %2024 = vmatmul.msk.f32.gmra.mxu2 %vm320_vm1, %v542_v35 }
 0x170   :  { %v473_v41 = vpop.f32.mrf.mxu1 }
 0x171   :  { %v474_v46 = vadd.f32 %v2424_v7, %v473_v41 }
 0x173   :  { %v543_v49 = vmax.f32 %v474_v46, 0.0 }
 0x175   :  { %1566 = vst.msk [vmem:[%s3900_s7 + $0x68] sm:$0xff] %vm320_vm1, %v543_v49  ;;  %2025 = vmatmul.msk.f32.gmra.mxu2 %vm320_vm1, %v543_v49 }
 0x178   :  { %v476_v53 = vpop.f32.mrf.mxu1 }
 0x179   :  { %v477_v56 = vadd.f32 %v2424_v7, %v476_v53 }
 0x17b   :  { %v544_v58 = vmax.f32 %v477_v56, 0.0 }
 0x17d   :  { %1567 = vst.msk [vmem:[%s3900_s7 + $0x70] sm:$0xff] %vm320_vm1, %v544_v58  ;;  %2026 = vmatmul.msk.f32.gmra.mxu2 %vm320_vm1, %v544_v58 }
 0x180   :  { %v479_v1 = vpop.f32.mrf.mxu1 }
 0x181   :  { %v480_v4 = vadd.f32 %v2424_v7, %v479_v1 }
 0x183   :  { %v545_v5 = vmax.f32 %v480_v4, 0.0 }
 0x185   :  { %1568 = vst.msk [vmem:[%s3900_s7 + $0x78] sm:$0xff] %vm320_vm1, %v545_v5  ;;  %2027 = vmatmul.msk.f32.gmra.mxu2 %vm320_vm1, %v545_v5 }
 0x188   :  { %v482_v11 = vpop.f32.mrf.mxu1 }
 0x189   :  { %v483_v12 = vadd.f32 %v2424_v7, %v482_v11 }
 0x18b   :  { %v546_v13 = vmax.f32 %v483_v12, 0.0 }
 0x18d   :  { %1569 = vst.msk [vmem:[%s3900_s7 + $0x80] sm:$0xff] %vm320_vm1, %v546_v13  ;;  %2028 = vmatmul.msk.f32.gmra.mxu2 %vm320_vm1, %v546_v13 }
 0x190   :  { %v687_v18 = vpop.f32.mrf.mxu2  ;;  %v485_v17 = vpop.f32.mrf.mxu1 }
 0x191   :  { %v2537_v19 = vadd.f32 %v2533_v15, %v687_v18  ;;  %v486_v18 = vadd.f32 %v2424_v7, %v485_v17 }
 0x193   :  { %1618 = vrot.lane.b32.xlu1 %v2537_v19, %s2199_s13  ;;  %v784_v21 = vsel %vm783_vm2, %v2537_v19, -inf }
 0x194   :  { %785 = vmax.xlane.f32.xlu0 %v784_v21  ;;  %v247_v21 = vadd.f32 %v2325_v23, %v246_v20 }
 0x198   :  { %v690_v22 = vpop.f32.mrf.mxu2 }
 0x199   :  { %v2553_v24 = vadd.f32 %v2533_v15, %v690_v22  ;;  %v547_v22 = vmax.f32 %v486_v18, 0.0 }
 0x19b   :  { %1620 = vrot.lane.b32.xlu2 %v2553_v24, %s2199_s13  ;;  %v787_v25 = vsel %vm783_vm2, %v2553_v24, -inf  ;;  %1570 = vst.msk [vmem:[%s3900_s7 + $0x88] sm:$0xff] %vm320_vm1, %v547_v22  ;;  %2029 = vmatmul.msk.f32.gmra.mxu2 %vm320_vm1, %v547_v22 }
 0x19c   :  { %788 = vmax.xlane.f32.xlu0 %v787_v25  ;;  %v298_v25 = vmax.f32 %v247_v21, 0.0 }
 0x19e   :  { %2002 = vmatmul.msk.f32.gmra.mxu1 %vm320_vm1, %v298_v25 }
 0x1a0   :  { %v693_v26 = vpop.f32.mrf.mxu2 }
 0x1a1   :  { %v2565_v29 = vadd.f32 %v2533_v15, %v693_v26 }
 0x1a3   :  { %v790_v39 = vsel %vm783_vm2, %v2565_v29, -inf }
 0x1a8   :  { %v696_v27 = vpop.f32.mrf.mxu2 }
 0x1a9   :  { %v2560_v28 = vadd.f32 %v2533_v15, %v696_v27 }
 0x1ab   :  { %1624 = vrot.lane.b32.xlu2 %v2560_v28, %s2199_s13  ;;  %v793_v52 = vsel %vm783_vm2, %v2560_v28, -inf }
 0x1ac   :  { %v488_v53 = vpop.f32.mrf.mxu1 }
 0x1ad   :  { %v489_v55 = vadd.f32 %v2424_v7, %v488_v53 }
 0x1af   :  { %v548_v56 = vmax.f32 %v489_v55, 0.0 }
 0x1b0   :  { %v699_v30 = vpop.f32.mrf.mxu2  ;;  %1622 = vrot.lane.b32.xlu0 %v2565_v29, %s2199_s13 }
 0x1b1   :  { %v2614_v63 = vadd.f32 %v2533_v15, %v699_v30  ;;  %v249_v30 = vpop.f32.mrf.mxu0  ;;  %1571 = vst.msk [vmem:[%s3900_s7 + $0x90] sm:$0xff] %vm320_vm1, %v548_v56  ;;  %2030 = vmatmul.msk.f32.gmra.mxu2 %vm320_vm1, %v548_v56 }
 0x1b2   :  { %v250_v31 = vadd.f32 %v2325_v23, %v249_v30 }
 0x1b3   :  { %v796_v43 = vsel %vm783_vm2, %v2614_v63, -inf }
 0x1b4   :  { %v299_v33 = vmax.f32 %v250_v31, 0.0 }
 0x1b6   :  { %2003 = vmatmul.msk.f32.gmra.mxu1 %vm320_vm1, %v299_v33 }
 0x1b8   :  { %v702_v37 = vpop.f32.mrf.mxu2 }
 0x1b9   :  { %v2572_v38 = vadd.f32 %v2533_v15, %v702_v37  ;;  %v252_v57 = vpop.f32.mrf.mxu0 }
 0x1ba   :  { %v253_v59 = vadd.f32 %v2325_v23, %v252_v57 }
 0x1bb   :  { %1628 = vrot.lane.b32.xlu0 %v2572_v38, %s2199_s13  ;;  %v799_v48 = vsel %vm783_vm2, %v2572_v38, -inf }
 0x1bd   :  { %791 = vmax.xlane.f32.xlu1 %v790_v39  ;;  %v55_v39 = vld [vmem:[%s3894_s0 + $0xe8] sm:$0xff] }
 0x1be   :  { %1977 = vmatmul.msk.f32.gmra.mxu3 %vm66_vm0, %v55_v39 }
 0x1c0   :  { %v705_v44 = vpop.f32.mrf.mxu2 }
 0x1c1   :  { %v2630_v50 = vadd.f32 %v2533_v15, %v705_v44  ;;  %v491_v44 = vpop.f32.mrf.mxu1 }
 0x1c2   :  { %v492_v45 = vadd.f32 %v2424_v7, %v491_v44 }
 0x1c3   :  { %v802_v0 = vsel %vm783_vm2, %v2630_v50, -inf }
 0x1c5   :  { %794 = vmax.xlane.f32.xlu1 %v793_v52 }
 0x1c6   :  { %1978 = vmatmul.msk.f32.gmra.mxu3 %vm66_vm0, %v56_v51 }
 0x1c8   :  { %v708_v60 = vpop.f32.mrf.mxu2 }
 0x1c9   :  { %v2635_v61 = vadd.f32 %v2533_v15, %v708_v60 }
 0x1cb   :  { %v805_v26 = vsel %vm783_vm2, %v2635_v61, -inf }
 0x1ce   :  { %1979 = vmatmul.msk.f32.gmra.mxu3 %vm66_vm0, %v57_v54 }
 0x1cf   :  { %v255_v1 = vpop.f32.mrf.mxu3 }
 0x1d0   :  { %v711_v62 = vpop.f32.mrf.mxu2  ;;  %v256_v4 = vadd.f32 %v2325_v23, %v255_v1 }
 0x1d1   :  { %v2644_v3 = vadd.f32 %v2533_v15, %v711_v62  ;;  %v494_v62 = vpop.f32.mrf.mxu1 }
 0x1d2   :  { %v301_v8 = vmax.f32 %v256_v4, 0.0 }
 0x1d3   :  { %v808_v36 = vsel %vm783_vm2, %v2644_v3, -inf }
 0x1d4   :  { %797 = vmax.xlane.f32.xlu2 %v796_v43  ;;  %v300_v43 = vmax.f32 %v253_v59, 0.0 }
 0x1d6   :  { %2004 = vmatmul.msk.f32.vlgmr.msrb.gmra.mxu3 %vm320_vm1, %v300_v43 }
 0x1d8   :  { %v714_v34 = vpop.f32.mrf.mxu2 }
 0x1d9   :  { %v2701_v37 = vadd.f32 %v2533_v15, %v714_v34 }
 0x1db   :  { %v811_v40 = vsel %vm783_vm2, %v2701_v37, -inf }
 0x1dc   :  { %800 = vmax.xlane.f32.xlu2 %v799_v48  ;;  %v549_v48 = vmax.f32 %v492_v45, 0.0 }
 0x1dd   :  { %v497_v33 = vpop.f32.mrf.mxu1 }
 0x1de   :  { %1626 = vrot.lane.b32.xlu1 %v2614_v63, %s2199_s13  ;;  %1572 = vst.msk [vmem:[%s3900_s7 + $0x98] sm:$0xff] %vm320_vm1, %v549_v48  ;;  %2031 = vmatmul.msk.f32.gmra.mxu2 %vm320_vm1, %v549_v48  ;;  %v498_v34 = vadd.f32 %v2424_v7, %v497_v33 }
 0x1df   :  { %2005 = vmatmul.msk.f32.gmra.mxu3 %vm320_vm1, %v301_v8 }
 0x1e0   :  { %v717_v42 = vpop.f32.mrf.mxu2 }
 0x1e1   :  { %v2714_v46 = vadd.f32 %v2533_v15, %v717_v42 }
 0x1e3   :  { %v814_v10 = vsel %vm783_vm2, %v2714_v46, -inf }
 0x1e5   :  { %803 = vmax.xlane.f32.xlu0 %v802_v0 }
 0x1e6   :  { %1632 = vrot.lane.b32.xlu1 %v2635_v61, %s2199_s13 }
 0x1e8   :  { %v720_v49 = vpop.f32.mrf.mxu2 }
 0x1e9   :  { %v2726_v52 = vadd.f32 %v2533_v15, %v720_v49 }
 0x1eb   :  { %v817_v17 = vsel %vm783_vm2, %v2726_v52, -inf }
 0x1f0   :  { %v723_v12 = vpop.f32.mrf.mxu2 }
 0x1f4   :  { %1630 = vrot.lane.b32.xlu2 %v2630_v50, %s2199_s13 }
 0x1f5   :  { %v1621_v2 = vpop.permute.xlu2 %1620 }
 0x1f6   :  { %1716 = vst.msk [vmem:[%s3900_s7 + $0x8] sm:$0xff] %vm1714_vm3, %v1621_v2  ;;  %v495_v2 = vadd.f32 %v2424_v7, %v494_v62 }
 0x1f8   :  { %v550_v6 = vmax.f32 %v495_v2, 0.0  ;;  %v726_v25 = vpop.f32.mrf.mxu2 }
 0x1f9   :  { %1634 = vrot.lane.b32.xlu0 %v2644_v3, %s2199_s13 }
 0x1fa   :  { %2032 = vmatmul.msk.f32.gmra.mxu2 %vm320_vm1, %v550_v6  ;;  %1573 = vst.msk [vmem:[%s3900_s7 + $0xa0] sm:$0xff] %vm320_vm1, %v550_v6 }
 0x200   :  { %v729_v31 = vpop.f32.mrf.mxu2 }
 0x201   :  { %v2802_v32 = vadd.f32 %v2533_v15, %v729_v31 }
 0x203   :  { %v826_v1 = vsel %vm783_vm2, %v2802_v32, -inf }
 0x205   :  { %v1625_v14 = vpop.permute.xlu2 %1624  ;;  %v1619_v16 = vpop.permute.xlu1 %1618 }
 0x206   :  { %1718 = vst.msk [vmem:[%s3900_s7 + $0x18] sm:$0xff] %vm1714_vm3, %v1625_v14  ;;  %v2782_v14 = vadd.f32 %v2533_v15, %v723_v12 }
 0x207   :  { %1715 = vst.msk [vmem:[%s3900_s7] sm:$0xff] %vm1714_vm3, %v1619_v16  ;;  %v2688_v27 = vpop.xlane.xlu0 %785  ;;  %v258_v16 = vpop.f32.mrf.mxu3 }
 0x208   :  { %v259_v18 = vadd.f32 %v2325_v23, %v258_v16  ;;  %v820_v21 = vsel %vm783_vm2, %v2782_v14, -inf  ;;  %v732_v55 = vpop.f32.mrf.mxu2 }
 0x209   :  { %v2830_v43 = vadd.f32 %v2533_v15, %v732_v55 }
 0x20a   :  { %v302_v20 = vmax.f32 %v259_v18, 0.0 }
 0x20b   :  { %v829_v2 = vsel %vm783_vm2, %v2830_v43, -inf }
 0x20c   :  { %2006 = vmatmul.msk.f32.gmra.mxu3 %vm320_vm1, %v302_v20 }
 0x20f   :  { %v2696_v35 = vpop.xlane.xlu0 %788  ;;  %v261_v39 = vpop.f32.mrf.mxu3 }
 0x210   :  { %806 = vmax.xlane.f32.xlu1 %v805_v26  ;;  %v2793_v26 = vadd.f32 %v2533_v15, %v726_v25  ;;  %v735_v8 = vpop.f32.mrf.mxu2 }
 0x211   :  { %v2856_v12 = vadd.f32 %v2533_v15, %v735_v8 }
 0x212   :  { %v823_v54 = vsel %vm783_vm2, %v2793_v26, -inf }
 0x217   :  { %v264_v45 = vpop.f32.mrf.mxu3 }
 0x218   :  { %v265_v48 = vadd.f32 %v2325_v23, %v264_v45 }
 0x21a   :  { %v304_v4 = vmax.f32 %v265_v48, 0.0 }
 0x21b   :  { %v500_v42 = vpop.f32.mrf.mxu1 }
 0x21d   :  { %809 = vmax.xlane.f32.xlu2 %v808_v36  ;;  %v551_v36 = vmax.f32 %v498_v34, 0.0 }
 0x21e   :  { %v738_v16 = vpop.f32.mrf.mxu2 }
 0x21f   :  { %1574 = vst.msk [vmem:[%s3900_s7 + $0xa8] sm:$0xff] %vm320_vm1, %v551_v36  ;;  %2033 = vmatmul.msk.f32.gmra.mxu2 %vm320_vm1, %v551_v36 }
 0x222   :  { %v1623_v41 = vpop.permute.xlu0 %1622 }
 0x223   :  { %1717 = vst.msk [vmem:[%s3900_s7 + $0x10] sm:$0xff] %vm1714_vm3, %v1623_v41  ;;  %812 = vmax.xlane.f32.xlu0 %v811_v40  ;;  %v262_v40 = vadd.f32 %v2325_v23, %v261_v39  ;;  %v882_v39 = vsub.f32 %v2553_v24, %v2696_v35  ;;  %v832_v24 = vsel %vm783_vm2, %v2856_v12, -inf }
 0x225   :  { %v303_v41 = vmax.f32 %v262_v40, 0.0  ;;  %v915_v40 = vmul.f32 1.442695, %v882_v39 }
 0x227   :  { %2007 = vmatmul.msk.f32.gmra.mxu3 %vm320_vm1, %v303_v41  ;;  %2070 = vpow2.f32 %v915_v40 }
 0x229   :  { %1638 = vrot.lane.b32.xlu1 %v2714_v46, %s2199_s13 }
 0x22d   :  { %v1629_v47 = vpop.permute.xlu0 %1628 }
 0x22e   :  { %1720 = vst.msk [vmem:[%s3900_s7 + $0x28] sm:$0xff] %vm1714_vm3, %v1629_v47  ;;  %v501_v47 = vadd.f32 %v2424_v7, %v500_v42 }
 0x22f   :  { %2008 = vmatmul.msk.f32.gmra.mxu3 %vm320_vm1, %v304_v4 }
 0x230   :  { %v2738_v58 = vpop.xlane.xlu1 %791  ;;  %v552_v49 = vmax.f32 %v501_v47, 0.0 }
 0x231   :  { %v883_v41 = vsub.f32 %v2565_v29, %v2738_v58 }
 0x232   :  { %1575 = vst.msk [vmem:[%s3900_s7 + $0xb0] sm:$0xff] %vm320_vm1, %v552_v49  ;;  %2034 = vmatmul.msk.f32.gmra.mxu2 %vm320_vm1, %v552_v49 }
 0x233   :  { %v503_v56 = vpop.f32.mrf.mxu1  ;;  %v917_v49 = vmul.f32 1.442695, %v883_v41 }
 0x234   :  { %v504_v57 = vadd.f32 %v2424_v7, %v503_v56 }
 0x235   :  { %1636 = vrot.lane.b32.xlu2 %v2701_v37, %s2199_s13 }
 0x236   :  { %v553_v44 = vmax.f32 %v504_v57, 0.0 }
 0x237   :  { %1640 = vrot.lane.b32.xlu0 %v2726_v52, %s2199_s13 }
 0x238   :  { %v2755_v0 = vpop.xlane.xlu1 %794  ;;  %1576 = vst.msk [vmem:[%s3900_s7 + $0xb8] sm:$0xff] %vm320_vm1, %v553_v44 }
 0x23a   :  { %2035 = vmatmul.msk.f32.gmra.mxu2 %vm320_vm1, %v553_v44 }
 0x241   :  { %v267_v6 = vpop.f32.mrf.mxu3 }
 0x247   :  { %v2748_v60 = vpop.xlane.xlu2 %797 }
 0x249   :  { %v270_v18 = vpop.f32.mrf.mxu3 }
 0x24a   :  { %v271_v20 = vadd.f32 %v2325_v23, %v270_v18 }
 0x24f   :  { %v2759_v5 = vpop.xlane.xlu2 %800 }
 0x250   :  { %v1627_v9 = vpop.permute.xlu1 %1626 }
 0x251   :  { %1719 = vst.msk [vmem:[%s3900_s7 + $0x20] sm:$0xff] %vm1714_vm3, %v1627_v9  ;;  %v268_v9 = vadd.f32 %v2325_v23, %v267_v6  ;;  %v273_v25 = vpop.f32.mrf.mxu3 }
 0x253   :  { %815 = vmax.xlane.f32.xlu1 %v814_v10 }
 0x257   :  { %v1631_v11 = vpop.permute.xlu2 %1630 }
 0x258   :  { %1721 = vst.msk [vmem:[%s3900_s7 + $0x30] sm:$0xff] %vm1714_vm3, %v1631_v11  ;;  %v1633_v13 = vpop.permute.xlu1 %1632  ;;  %v2790_v22 = vpop.xlane.xlu0 %803  ;;  %v305_v11 = vmax.f32 %v268_v9, 0.0 }
 0x259   :  { %1722 = vst.msk [vmem:[%s3900_s7 + $0x38] sm:$0xff] %vm1714_vm3, %v1633_v13  ;;  %v506_v33 = vpop.f32.mrf.mxu3 }
 0x25a   :  { %2009 = vmatmul.msk.f32.gmra.mxu3 %vm320_vm1, %v305_v11  ;;  %v507_v34 = vadd.f32 %v2424_v7, %v506_v33 }
 0x25c   :  { %v554_v36 = vmax.f32 %v507_v34, 0.0 }
 0x25e   :  { %818 = vmax.xlane.f32.xlu2 %v817_v17  ;;  %v2865_v17 = vadd.f32 %v2533_v15, %v738_v16  ;;  %1577 = vst.msk [vmem:[%s3900_s7 + $0xc0] sm:$0xff] %vm320_vm1, %v554_v36 }
 0x260   :  { %v835_v8 = vsel %vm783_vm2, %v2865_v17, -inf }
 0x261   :  { %821 = vmax.xlane.f32.xlu0 %v820_v21  ;;  %v306_v21 = vmax.f32 %v271_v20, 0.0 }
 0x263   :  { %2010 = vmatmul.msk.f32.gmra.mxu3 %vm320_vm1, %v306_v21 }
 0x26b   :  { %v1635_v30 = vpop.permute.xlu0 %1634 }
 0x26c   :  { %1644 = vrot.lane.b32.xlu1 %v2793_v26, %s2199_s13  ;;  %1723 = vst.msk [vmem:[%s3900_s7 + $0x40] sm:$0xff] %vm1714_vm3, %v1635_v30  ;;  %v274_v30 = vadd.f32 %v2325_v23, %v273_v25  ;;  %v881_v23 = vsub.f32 %v2537_v19, %v2688_v27  ;;  %v509_v19 = vpop.f32.mrf.mxu3  ;;  %v741_v27 = vpop.f32.mrf.mxu2 }
 0x26d   :  { %v510_v29 = vadd.f32 %v2424_v7, %v509_v19  ;;  %v2907_v44 = vadd.f32 %v2533_v15, %v741_v27 }
 0x26e   :  { %v307_v31 = vmax.f32 %v274_v30, 0.0  ;;  %v913_v47 = vmul.f32 1.442695, %v881_v23  ;;  %v886_v23 = vsub.f32 %v2572_v38, %v2759_v5 }
 0x26f   :  { %v555_v57 = vmax.f32 %v510_v29, 0.0 }
 0x270   :  { %2011 = vmatmul.msk.f32.gmra.mxu3 %vm320_vm1, %v307_v31  ;;  %2072 = vpow2.f32 %v913_v47  ;;  %v885_v31 = vsub.f32 %v2614_v63, %v2748_v60  ;;  %v923_v63 = vmul.f32 1.442695, %v886_v23 }
 0x271   :  { %2074 = vpow2.f32 %v917_v49  ;;  %1578 = vst.msk [vmem:[%s3900_s7 + $0xc8] sm:$0xff] %vm320_vm1, %v555_v57 }
 0x272   :  { %v921_v34 = vmul.f32 1.442695, %v885_v31 }
 0x274   :  { %v744_v11 = vpop.f32.mrf.mxu2  ;;  %2076 = vpow2.f32 %v921_v34 }
 0x275   :  { %1646 = vrot.lane.b32.xlu0 %v2802_v32, %s2199_s13  ;;  %v2942_v20 = vadd.f32 %v2533_v15, %v744_v11 }
 0x276   :  { %1642 = vrot.lane.b32.xlu2 %v2782_v14, %s2199_s13 }
 0x278   :  { %2036 = vmatmul.msk.f32.vlgmr.msra.gmra.mxu3 %vm320_vm1, %v554_v36  ;;  %v884_v36 = vsub.f32 %v2560_v28, %v2755_v0  ;;  %v841_v0 = vsel %vm783_vm2, %v2942_v20, -inf }
 0x27a   :  { %v919_v41 = vmul.f32 1.442695, %v884_v36 }
 0x27c   :  { %2078 = vpow2.f32 %v919_v41 }
 0x27d   :  { %v747_v16 = vpop.f32.mrf.mxu2  ;;  %2080 = vpow2.f32 %v923_v63 }
 0x27e   :  { %v2939_v18 = vadd.f32 %v2533_v15, %v747_v16 }
 0x280   :  { %2037 = vmatmul.msk.f32.gmra.mxu3 %vm320_vm1, %v555_v57 }
 0x283   :  { %v2824_v53 = vpop.xlane.xlu1 %806 }
 0x284   :  { %v888_v23 = vsub.f32 %v2635_v61, %v2824_v53 }
 0x290   :  { %v2817_v51 = vpop.xlane.xlu2 %809 }
 0x291   :  { %v889_v61 = vsub.f32 %v2644_v3, %v2817_v51 }
 0x296   :  { %824 = vmax.xlane.f32.xlu1 %v823_v54  ;;  %v2852_v10 = vpop.xlane.xlu0 %812  ;;  %v2893_v54 = vpop.eup %2070 }
 0x297   :  { %v2900_v58 = vpop.eup %2072  ;;  %v980_v56 = vsel %vm783_vm2, %v2893_v54, 0.0 }
 0x298   :  { %v1637_v59 = vpop.permute.xlu2 %1636  ;;  %v977_v45 = vsel %vm783_vm2, %v2900_v58, 0.0 }
 0x299   :  { %1724 = vst.msk [vmem:[%s3900_s7 + $0x48] sm:$0xff] %vm1714_vm3, %v1637_v59  ;;  %v2904_v59 = vpop.eup %2074 }
 0x29a   :  { %v983_v48 = vsel %vm783_vm2, %v2904_v59, 0.0  ;;  %v2972_v47 = vpop.eup %2076 }
 0x29b   :  { %v1639_v62 = vpop.permute.xlu1 %1638  ;;  %v989_v38 = vsel %vm783_vm2, %v2972_v47, 0.0  ;;  %v2986_v29 = vpop.eup %2078 }
 0x29c   :  { %1725 = vst.msk [vmem:[%s3900_s7 + $0x50] sm:$0xff] %vm1714_vm3, %v1639_v62  ;;  %v986_v57 = vsel %vm783_vm2, %v2986_v29, 0.0 }
 0x29f   :  { %827 = vmax.xlane.f32.xlu2 %v826_v1  ;;  %830 = vmax.xlane.f32.xlu0 %v829_v2  ;;  %v838_v1 = vsel %vm783_vm2, %v2907_v44, -inf  ;;  %v512_v2 = vpop.f32.mrf.mxu3 }
 0x2a0   :  { %v513_v6 = vadd.f32 %v2424_v7, %v512_v2 }
 0x2a2   :  { %v556_v9 = vmax.f32 %v513_v6, 0.0  ;;  %v750_v28 = vpop.f32.mrf.mxu2  ;;  %v844_v6 = vsel %vm783_vm2, %v2939_v18, -inf }
 0x2a4   :  { %1579 = vst.msk [vmem:[%s3900_s7 + $0xd0] sm:$0xff] %vm320_vm1, %v556_v9  ;;  %2038 = vmatmul.msk.f32.gmra.mxu3 %vm320_vm1, %v556_v9 }
 0x2a9   :  { %v1641_v13 = vpop.permute.xlu0 %1640 }
 0x2aa   :  { %1726 = vst.msk [vmem:[%s3900_s7 + $0x58] sm:$0xff] %vm1714_vm3, %v1641_v13  ;;  %v515_v21 = vpop.f32.mrf.mxu3 }
 0x2ab   :  { %v516_v25 = vadd.f32 %v2424_v7, %v515_v21 }
 0x2ad   :  { %v557_v30 = vmax.f32 %v516_v25, 0.0 }
 0x2af   :  { %1650 = vrot.lane.b32.xlu1 %v2856_v12, %s2199_s13  ;;  %1580 = vst.msk [vmem:[%s3900_s7 + $0xd8] sm:$0xff] %vm320_vm1, %v557_v30  ;;  %2039 = vmatmul.msk.f32.gmra.mxu3 %vm320_vm1, %v557_v30 }
 0x2b2   :  { %v518_v49 = vpop.f32.mrf.mxu3 }
 0x2b3   :  { %1652 = vrot.lane.b32.xlu0 %v2865_v17, %s2199_s13  ;;  %v519_v5 = vadd.f32 %v2424_v7, %v518_v49 }
 0x2b5   :  { %v558_v19 = vmax.f32 %v519_v5, 0.0 }
 0x2b7   :  { %1648 = vrot.lane.b32.xlu2 %v2830_v43, %s2199_s13  ;;  %1581 = vst.msk [vmem:[%s3900_s7 + $0xe0] sm:$0xff] %vm320_vm1, %v558_v19  ;;  %2040 = vmatmul.msk.f32.gmra.mxu3 %vm320_vm1, %v558_v19  ;;  %v929_v19 = vmul.f32 1.442695, %v889_v61 }
 0x2c6   :  { %v2891_v35 = vpop.xlane.xlu1 %815 }
 0x2c7   :  { %v891_v5 = vsub.f32 %v2714_v46, %v2891_v35 }
 0x2d1   :  { %v2887_v42 = vpop.xlane.xlu2 %818 }
 0x2d4   :  { %v2924_v4 = vpop.xlane.xlu0 %821 }
 0x2d9   :  { %v1643_v55 = vpop.permute.xlu2 %1642  ;;  %833 = vmax.xlane.f32.xlu1 %v832_v24 }
 0x2da   :  { %1727 = vst.msk [vmem:[%s3900_s7 + $0x60] sm:$0xff] %vm1714_vm3, %v1643_v55  ;;  %v2984_v55 = vadd.f32 %v2533_v15, %v750_v28  ;;  %v887_v28 = vsub.f32 %v2630_v50, %v2790_v22 }
 0x2dc   :  { %v925_v49 = vmul.f32 1.442695, %v887_v28 }
 0x2dd   :  { %981 = vadd.xlane.f32.xlu0 %v980_v56  ;;  %v2997_v56 = vpop.eup %2080 }
 0x2de   :  { %v1645_v62 = vpop.permute.xlu1 %1644 }
 0x2df   :  { %1728 = vst.msk [vmem:[%s3900_s7 + $0x68] sm:$0xff] %vm1714_vm3, %v1645_v62 }
 0x2e0   :  { %978 = vadd.xlane.f32.xlu2 %v977_v45  ;;  %v847_v45 = vsel %vm783_vm2, %v2984_v55, -inf }
 0x2e1   :  { %984 = vadd.xlane.f32.xlu1 %v983_v48  ;;  %v521_v48 = vpop.f32.mrf.mxu3 }
 0x2e2   :  { %v522_v62 = vadd.f32 %v2424_v7, %v521_v48 }
 0x2e4   :  { %v559_v2 = vmax.f32 %v522_v62, 0.0 }
 0x2e5   :  { %839 = vmax.xlane.f32.xlu0 %v838_v1  ;;  %v992_v1 = vsel %vm783_vm2, %v2997_v56, 0.0 }
 0x2e6   :  { %1582 = vst.msk [vmem:[%s3900_s7 + $0xe8] sm:$0xff] %vm320_vm1, %v559_v2  ;;  %2041 = vmatmul.msk.f32.gmra.mxu3 %vm320_vm1, %v559_v2 }
 0x2e7   :  { %v1647_v13 = vpop.permute.xlu0 %1646 }
 0x2e8   :  { %836 = vmax.xlane.f32.xlu2 %v835_v8  ;;  %1729 = vst.msk [vmem:[%s3900_s7 + $0x70] sm:$0xff] %vm1714_vm3, %v1647_v13  ;;  %v753_v8 = vpop.f32.mrf.mxu2 }
 0x2e9   :  { %v524_v13 = vpop.f32.mrf.mxu3  ;;  %v3020_v21 = vadd.f32 %v2533_v15, %v753_v8 }
 0x2ea   :  { %v525_v16 = vadd.f32 %v2424_v7, %v524_v13 }
 0x2eb   :  { %v850_v3 = vsel %vm783_vm2, %v3020_v21, -inf }
 0x2ec   :  { %v560_v25 = vmax.f32 %v525_v16, 0.0 }
 0x2ee   :  { %1583 = vst.msk [vmem:[%s3900_s7 + $0xf0] sm:$0xff] %vm320_vm1, %v560_v25  ;;  %2042 = vmatmul.msk.f32.gmra.mxu3 %vm320_vm1, %v560_v25 }
 0x2f0   :  { %v756_v9 = vpop.f32.mrf.mxu2 }
 0x2f1   :  { %v3014_v11 = vadd.f32 %v2533_v15, %v756_v9 }
 0x2f3   :  { %v527_v30 = vpop.f32.mrf.mxu3 }
 0x2f4   :  { %v528_v31 = vadd.f32 %v2424_v7, %v527_v30 }
 0x2f6   :  { %v561_v34 = vmax.f32 %v528_v31, 0.0 }
 0x2f8   :  { %1585 = vst.msk [vmem:[%s3900_s7 + $0xf8] sm:$0x3] %vm1584_vm4, %v561_v34  ;;  %2043 = vmatmul.msk.f32.gmra.mxu3 %vm320_vm1, %v561_v34 }
 0x2f9   :  { %1658 = vrot.lane.b32.xlu0 %v2939_v18, %s2199_s13 }
 0x2fa   :  { %1656 = vrot.lane.b32.xlu1 %v2942_v20, %s2199_s13 }
 0x2fb   :  { %v759_v50 = vpop.f32.mrf.mxu3 }
 0x300   :  { %1654 = vrot.lane.b32.xlu2 %v2907_v44, %s2199_s13 }
 0x303   :  { %v762_v9 = vpop.f32.mrf.mxu3 }
 0x304   :  { %v3097_v25 = vadd.f32 %v2533_v15, %v762_v9 }
 0x309   :  { %v2962_v39 = vpop.xlane.xlu1 %824 }
 0x30a   :  { %v894_v61 = vsub.f32 %v2793_v26, %v2962_v39 }
 0x312   :  { %v2958_v33 = vpop.xlane.xlu2 %827  ;;  %v2970_v60 = vpop.xlane.xlu0 %830 }
 0x31a   :  { %v1649_v40 = vpop.permute.xlu2 %1648 }
 0x31b   :  { %1730 = vst.msk [vmem:[%s3900_s7 + $0x78] sm:$0xff] %vm1714_vm3, %v1649_v40  ;;  %v927_v40 = vmul.f32 1.442695, %v888_v23 }
 0x31d   :  { %2082 = vpow2.f32 %v927_v40  ;;  %v890_v40 = vsub.f32 %v2701_v37, %v2852_v10  ;;  %v939_v10 = vmul.f32 1.442695, %v894_v61 }
 0x31e   :  { %2084 = vpow2.f32 %v925_v49 }
 0x31f   :  { %2086 = vpow2.f32 %v929_v19  ;;  %v931_v49 = vmul.f32 1.442695, %v890_v40 }
 0x321   :  { %v1651_v24 = vpop.permute.xlu1 %1650 }
 0x322   :  { %1731 = vst.msk [vmem:[%s3900_s7 + $0x80] sm:$0xff] %vm1714_vm3, %v1651_v24 }
 0x323   :  { %990 = vadd.xlane.f32.xlu0 %v989_v38  ;;  %v3052_v24 = vpop.eup %2082 }
 0x324   :  { %842 = vmax.xlane.f32.xlu1 %v841_v0  ;;  %v998_v22 = vsel %vm783_vm2, %v3052_v24, 0.0 }
 0x325   :  { %v1653_v27 = vpop.permute.xlu0 %1652 }
 0x326   :  { %1732 = vst.msk [vmem:[%s3900_s7 + $0x88] sm:$0xff] %vm1714_vm3, %v1653_v27  ;;  %v3065_v27 = vadd.f32 %v2533_v15, %v759_v50 }
 0x327   :  { %v765_v13 = vpop.f32.mrf.mxu3 }
 0x328   :  { %v856_v46 = vsel %vm783_vm2, %v3065_v27, -inf  ;;  %v3094_v16 = vadd.f32 %v2533_v15, %v765_v13 }
 0x329   :  { %987 = vadd.xlane.f32.xlu2 %v986_v57  ;;  %v933_v57 = vmul.f32 1.442695, %v891_v5 }
 0x32b   :  { %848 = vmax.xlane.f32.xlu0 %v847_v45  ;;  %v3069_v45 = vpop.eup %2084  ;;  %2088 = vpow2.f32 %v933_v57 }
 0x32c   :  { %993 = vadd.xlane.f32.xlu1 %v992_v1  ;;  %v995_v48 = vsel %vm783_vm2, %v3069_v45, 0.0  ;;  %v3083_v62 = vpop.eup %2086  ;;  %2090 = vpow2.f32 %v931_v49 }
 0x32d   :  { %v1001_v2 = vsel %vm783_vm2, %v3083_v62, 0.0  ;;  %2092 = vpow2.f32 %v939_v10 }
 0x331   :  { %845 = vmax.xlane.f32.xlu2 %v844_v6  ;;  %v3085_v1 = vpop.eup %2088  ;;  %v853_v6 = vsel %vm783_vm2, %v3014_v11, -inf }
 0x332   :  { %v1007_v8 = vsel %vm783_vm2, %v3085_v1, 0.0  ;;  %v768_v5 = vpop.f32.mrf.mxu3  ;;  %v3136_v39 = vpop.eup %2090 }
 0x333   :  { %v3128_v37 = vadd.f32 %v2533_v15, %v768_v5  ;;  %v893_v5 = vsub.f32 %v2782_v14, %v2924_v4 }
 0x335   :  { %v865_v26 = vsel %vm783_vm2, %v3128_v37, -inf }
 0x33f   :  { %1664 = vrot.lane.b32.xlu0 %v3014_v11, %s2199_s13 }
 0x345   :  { %1662 = vrot.lane.b32.xlu1 %v3020_v21, %s2199_s13 }
 0x349   :  { %1660 = vrot.lane.b32.xlu2 %v2984_v55, %s2199_s13 }
 0x34c   :  { %v3044_v63 = vpop.xlane.xlu1 %833 }
 0x34d   :  { %v897_v10 = vsub.f32 %v2856_v12, %v3044_v63  ;;  %v895_v12 = vsub.f32 %v2802_v32, %v2958_v33 }
 0x350   :  { %v3040_v41 = vpop.xlane.xlu0 %981 }
 0x351   :  { %vm1092_vm15 = vweird.f32 %v3040_v41 }
 0x353   :  { %v3036_v36 = vpop.xlane.xlu2 %978 }
 0x354   :  { %v3058_v38 = vpop.xlane.xlu1 %984  ;;  %vm1078_vm6 = vweird.f32 %v3036_v36 }
 0x358   :  { %v3056_v53 = vpop.xlane.xlu0 %839 }
 0x35b   :  { %v3042_v7 = vpop.xlane.xlu2 %836 }
 0x363   :  { %v1655_v0 = vpop.permute.xlu2 %1654 }
 0x364   :  { %1733 = vst.msk [vmem:[%s3900_s7 + $0x90] sm:$0xff] %vm1714_vm3, %v1655_v0 }
 0x369   :  { %999 = vadd.xlane.f32.xlu0 %v998_v22  ;;  %v892_v22 = vsub.f32 %v2726_v52, %v2887_v42  ;;  %v859_v52 = vsel %vm783_vm2, %v3097_v25, -inf }
 0x36b   :  { %v1659_v51 = vpop.permute.xlu0 %1658  ;;  %v935_v57 = vmul.f32 1.442695, %v892_v22 }
 0x36c   :  { %1735 = vst.msk [vmem:[%s3900_s7 + $0xa0] sm:$0xff] %vm1714_vm3, %v1659_v51  ;;  %v1657_v35 = vpop.permute.xlu1 %1656  ;;  %v3146_v51 = vpop.eup %2092 }
 0x36d   :  { %1734 = vst.msk [vmem:[%s3900_s7 + $0x98] sm:$0xff] %vm1714_vm3, %v1657_v35  ;;  %2094 = vpow2.f32 %v935_v57  ;;  %v1016_v35 = vsel %vm783_vm2, %v3146_v51, 0.0 }
 0x36e   :  { %2096 = vrcp.f32 %v3036_v36 }
 0x36f   :  { %851 = vmax.xlane.f32.xlu1 %v850_v3  ;;  %v1004_v3 = vsel %vm783_vm2, %v3136_v39, 0.0 }
 0x371   :  { %857 = vmax.xlane.f32.xlu0 %v856_v46 }
 0x372   :  { %996 = vadd.xlane.f32.xlu2 %v995_v48  ;;  %v862_v48 = vsel %vm783_vm2, %v3094_v16, -inf }
 0x373   :  { %v3148_v46 = vpop.eup %2094 }
 0x374   :  { %v2097_v63 = vpop.eup %2096 }
 0x375   :  { %vm1079_vm5 = vweird.f32 %v2097_v63 }
 0x376   :  { %vm1080_vm7 = vmor %vm1078_vm6, %vm1079_vm5  ;;  %vm1106_vm5 = vweird.f32 %v3058_v38 }
 0x377   :  { %1002 = vadd.xlane.f32.xlu1 %v1001_v2  ;;  %v1010_v2 = vsel %vm783_vm2, %v3148_v46, 0.0 }
 0x379   :  { %1008 = vadd.xlane.f32.xlu0 %v1007_v8 }
 0x37a   :  { %854 = vmax.xlane.f32.xlu2 %v853_v6  ;;  %v771_v6 = vpop.f32.mrf.mxu3 }
 0x37b   :  { %v3162_v13 = vadd.f32 %v2533_v15, %v771_v6  ;;  %v1074_v6 = vmul.f32 %v2097_v63, %v3036_v36 }
 0x37d   :  { %v868_v33 = vsel %vm783_vm2, %v3162_v13, -inf }
 0x382   :  { %v774_v8 = vpop.f32.mrf.mxu3 }
 0x383   :  { %v3157_v9 = vadd.f32 %v2533_v15, %v774_v8 }
 0x38d   :  { %1670 = vrot.lane.b32.xlu0 %v3094_v16, %s2199_s13 }
 0x390   :  { %1668 = vrot.lane.b32.xlu1 %v3097_v25, %s2199_s13 }
 0x392   :  { %1666 = vrot.lane.b32.xlu2 %v3065_v27, %s2199_s13 }
 0x396   :  { %v3107_v31 = vpop.xlane.xlu0 %990 }
 0x397   :  { %v3111_v23 = vpop.xlane.xlu1 %842 }
 0x39c   :  { %v3105_v30 = vpop.xlane.xlu2 %987 }
 0x39d   :  { %vm1120_vm11 = vweird.f32 %v3105_v30 }
 0x39e   :  { %v3115_v28 = vpop.xlane.xlu0 %848 }
 0x39f   :  { %v3123_v50 = vpop.xlane.xlu1 %993 }
 0x3a4   :  { %v3109_v34 = vpop.xlane.xlu2 %845 }
 0x3ac   :  { %v1661_v0 = vpop.permute.xlu2 %1660 }
 0x3ad   :  { %1736 = vst.msk [vmem:[%s3900_s7 + $0xa8] sm:$0xff] %vm1714_vm3, %v1661_v0 }
 0x3b1   :  { %v1665_v19 = vpop.permute.xlu0 %1664 }
 0x3b2   :  { %1738 = vst.msk [vmem:[%s3900_s7 + $0xb8] sm:$0xff] %vm1714_vm3, %v1665_v19  ;;  %v777_v19 = vpop.f32.mrf.mxu3 }
 0x3b7   :  { %866 = vmax.xlane.f32.xlu0 %v865_v26  ;;  %v1663_v42 = vpop.permute.xlu1 %1662  ;;  %v937_v26 = vmul.f32 1.442695, %v893_v5 }
 0x3b8   :  { %1737 = vst.msk [vmem:[%s3900_s7 + $0xb0] sm:$0xff] %vm1714_vm3, %v1663_v42  ;;  %v945_v42 = vmul.f32 1.442695, %v897_v10  ;;  %v1075_v10 = vsub.f32 1.0, %v1074_v6 }
 0x3b9   :  { %2098 = vpow2.f32 %v937_v26  ;;  %v871_v26 = vsel %vm783_vm2, %v3157_v9, -inf }
 0x3ba   :  { %860 = vmax.xlane.f32.xlu1 %v859_v52  ;;  %v3187_v52 = vadd.f32 %v2533_v15, %v777_v19  ;;  %2100 = vpow2.f32 %v945_v42 }
 0x3bb   :  { %1005 = vadd.xlane.f32.xlu2 %v1004_v3 }
 0x3bc   :  { %v874_v14 = vsel %vm783_vm2, %v3187_v52, -inf }
 0x3bf   :  { %1017 = vadd.xlane.f32.xlu0 %v1016_v35  ;;  %v941_v35 = vmul.f32 1.442695, %v895_v12  ;;  %v1084_v12 = vand.u32 2147483648, %v3036_v36 }
 0x3c1   :  { %2102 = vpow2.f32 %v941_v35  ;;  %v1082_v35 = vand.u32 2147483647, %v3036_v36  ;;  %v1085_v6 = vor.u32 1.1754944e-38, %v1084_v12 }
 0x3c2   :  { %1011 = vadd.xlane.f32.xlu1 %v1010_v2  ;;  %2104 = vrcp.f32 %v3105_v30 }
 0x3c3   :  { %863 = vmax.xlane.f32.xlu2 %v862_v48  ;;  %v3198_v48 = vpop.eup %2098  ;;  %vm1083_vm8 = vcmp.eq.f32.partialorder %v1082_v35, 8.507059e+37 }
 0x3c4   :  { %v3204_v2 = vpop.eup %2100  ;;  %v1013_v32 = vsel %vm783_vm2, %v3198_v48, 0.0 }
 0x3c5   :  { %3903 = vst [vmem:[#allocation2_spill] sm:$0xff] %v3204_v2  ;;  %v1025_v8 = vsel %vm783_vm2, %v3204_v2, 0.0 }
 0x3c7   :  { %v3217_v19 = vpop.eup %2102 }
 0x3c8   :  { %v1019_v42 = vsel %vm783_vm2, %v3217_v19, 0.0  ;;  %v2105_v12 = vpop.eup %2104 }
 0x3c9   :  { %vm1121_vm9 = vweird.f32 %v2105_v12 }
 0x3ca   :  { %vm1122_vm12 = vmor %vm1120_vm11, %vm1121_vm9  ;;  %vm1910_vm11 = vcmask 1048320  }
 0x3d3   :  { %1676 = vrot.lane.b32.xlu0 %v3157_v9, %s2199_s13 }
 0x3db   :  { %1674 = vrot.lane.b32.xlu1 %v3162_v13, %s2199_s13  ;;  %1672 = vrot.lane.b32.xlu2 %v3128_v37, %s2199_s13 }
 0x3dc   :  { %v3168_v40 = vpop.xlane.xlu0 %999 }
 0x3e2   :  { %v3178_v22 = vpop.xlane.xlu1 %851 }
 0x3e4   :  { %v3172_v49 = vpop.xlane.xlu0 %857 }
 0x3e5   :  { %v3170_v0 = vpop.xlane.xlu2 %996 }
 0x3ea   :  { %v3196_v4 = vpop.xlane.xlu1 %1002 }
 0x3ec   :  { %v3189_v3 = vpop.xlane.xlu0 %1008 }
 0x3ed   :  { %v3174_v61 = vpop.xlane.xlu2 %854 }
 0x3f5   :  { %v1667_v57 = vpop.permute.xlu2 %1666 }
 0x3f6   :  { %1739 = vst.msk [vmem:[%s3900_s7 + $0xc0] sm:$0xff] %vm1714_vm3, %v1667_v57  ;;  %v1076_v57 = vmul.f32 %v2097_v63, %v1075_v10 }
 0x3fd   :  { %875 = vmax.xlane.f32.xlu0 %v874_v14  ;;  %v1077_v14 = vadd.f32 %v2097_v63, %v1076_v57 }
 0x3ff   :  { %v1671_v15 = vpop.permute.xlu0 %1670 }
 0x400   :  { %1741 = vst.msk [vmem:[%s3900_s7 + $0xd0] sm:$0xff] %vm1714_vm3, %v1671_v15  ;;  %v1081_v15 = vsel %vm1080_vm7, %v2097_v63, %v1077_v14 }
 0x402   :  { %v1669_v5 = vpop.permute.xlu1 %1668 }
 0x403   :  { %1740 = vst.msk [vmem:[%s3900_s7 + $0xc8] sm:$0xff] %vm1714_vm3, %v1669_v5  ;;  %v2198_v5 = vld [vmem:[%s3899_s6] ss:$0 sm:$0xff] }
 0x404   :  { %1014 = vadd.xlane.f32.xlu2 %v1013_v32  ;;  %v1086_v32 = vsel %vm1083_vm8, %v1085_v6, %v1081_v15  ;;  %vm1876_vm8 = vcmask 786048  }
 0x405   :  { %869 = vmax.xlane.f32.xlu1 %v868_v33  ;;  %1026 = vadd.xlane.f32.xlu0 %v1025_v8  ;;  %v1521_v33 = vmul.f32 %v2900_v58, %v1086_v32  ;;  %v780_v8 = vpop.f32.mrf.mxu3  ;;  %v900_v58 = vsub.f32 %v2942_v20, %v3111_v23  ;;  %v1116_v23 = vmul.f32 %v2105_v12, %v3105_v30 }
 0x406   :  { %v3231_v10 = vadd.f32 %v2198_v5, %v780_v8  ;;  %v898_v8 = vsub.f32 %v2865_v17, %v3042_v7  ;;  %v1124_v7 = vand.u32 2147483647, %v3105_v30 }
 0x407   :  { %v951_v57 = vmul.f32 1.442695, %v900_v58 }
 0x408   :  { %vm1125_vm13 = vcmp.eq.f32.partialorder %v1124_v7, 8.507059e+37 }
 0x409   :  { %2106 = vpow2.f32 %v951_v57 }
 0x40c   :  { %872 = vmax.xlane.f32.xlu2 %v871_v26 }
 0x40d   :  { %1020 = vadd.xlane.f32.xlu1 %v1019_v42  ;;  %v896_v42 = vsub.f32 %v2830_v43, %v2970_v60  ;;  %v1117_v43 = vsub.f32 1.0, %v1116_v23 }
 0x40f   :  { %v3252_v6 = vpop.eup %2106  ;;  %v943_v20 = vmul.f32 1.442695, %v896_v42  ;;  %v1118_v5 = vmul.f32 %v2105_v12, %v1117_v43  ;;  %v947_v42 = vmul.f32 1.442695, %v898_v8  ;;  %v878_v43 = vsel %vm877_vm10, %v3231_v10, -inf }
 0x410   :  { %3904 = vst [vmem:[#allocation3_spill] sm:$0xff] %v3252_v6  ;;  %v1034_v32 = vsel %vm783_vm2, %v3252_v6, 0.0 }
 0x411   :  { %2108 = vpow2.f32 %v943_v20  ;;  %v1126_v20 = vand.u32 2147483648, %v3105_v30 }
 0x412   :  { %2110 = vrcp.f32 %v3040_v41 }
 0x413   :  { %2112 = vpow2.f32 %v947_v42  ;;  %v1127_v8 = vor.u32 1.1754944e-38, %v1126_v20  ;;  %v1098_v20 = vand.u32 2147483648, %v3040_v41 }
 0x414   :  { %2114 = vrcp.f32 %v3058_v38 }
 0x415   :  { %2116 = vrcp.f32 %v3170_v0 }
 0x417   :  { %v3270_v58 = vpop.eup %2108 }
 0x418   :  { %v2111_v57 = vpop.eup %2110  ;;  %v1022_v23 = vsel %vm783_vm2, %v3270_v58, 0.0 }
 0x419   :  { %1780 = vrot.lane.b32.xlu0 %v1521_v33, %s2200_s12  ;;  %v1088_v17 = vmul.f32 %v2111_v57, %v3040_v41  ;;  %v3285_v30 = vpop.eup %2112  ;;  %vm1093_vm14 = vweird.f32 %v2111_v57 }
 0x41a   :  { %v2115_v2 = vpop.eup %2114  ;;  %vm1094_vm0 = vmor %vm1092_vm15, %vm1093_vm14  ;;  %vm1746_vm14 = vcmask 648704  }
 0x41b   :  { %vm1107_vm4 = vweird.f32 %v2115_v2 }
 0x41c   :  { %vm1108_vm6 = vmor %vm1106_vm5, %vm1107_vm4 }
 0x424   :  { %1678 = vrot.lane.b32.xlu2 %v3187_v52, %s2199_s13 }
 0x426   :  { %1680 = vrot.lane.b32.xlu1 %v3231_v10, %s2199_s13 }
 0x42a   :  { %v3241_v63 = vpop.xlane.xlu0 %866 }
 0x42d   :  { %v3248_v14 = vpop.xlane.xlu1 %860 }
 0x42e   :  { %v3237_v36 = vpop.xlane.xlu2 %1005 }
 0x432   :  { %v3250_v35 = vpop.xlane.xlu0 %1017 }
 0x435   :  { %v3262_v60 = vpop.xlane.xlu1 %1011 }
 0x436   :  { %v3244_v26 = vpop.xlane.xlu2 %863 }
 0x43e   :  { %v1673_v15 = vpop.permute.xlu2 %1672 }
 0x43f   :  { %1742 = vst.msk [vmem:[%s3900_s7 + $0xd8] sm:$0xff] %vm1714_vm3, %v1673_v15  ;;  %v1119_v15 = vadd.f32 %v2105_v12, %v1118_v5  ;;  %v1089_v5 = vsub.f32 1.0, %v1088_v17  ;;  %v1096_v17 = vand.u32 2147483647, %v3040_v41 }
 0x441   :  { %v1090_v42 = vmul.f32 %v2111_v57, %v1089_v5  ;;  %vm1097_vm1 = vcmp.eq.f32.partialorder %v1096_v17, 8.507059e+37 }
 0x443   :  { %1035 = vadd.xlane.f32.xlu0 %v1034_v32 }
 0x445   :  { %v1677_v33 = vpop.permute.xlu0 %1676 }
 0x446   :  { %1744 = vst.msk [vmem:[%s3900_s7 + $0xe8] sm:$0xff] %vm1714_vm3, %v1677_v33  ;;  %v1123_v33 = vsel %vm1122_vm12, %v2105_v12, %v1119_v15  ;;  %v1102_v12 = vmul.f32 %v2115_v2, %v3058_v38  ;;  %v1091_v15 = vadd.f32 %v2111_v57, %v1090_v42  ;;  %v1110_v42 = vand.u32 2147483647, %v3058_v38 }
 0x447   :  { %vm1162_vm12 = vweird.f32 %v3170_v0 }
 0x448   :  { %v1103_v7 = vsub.f32 1.0, %v1102_v12  ;;  %vm1111_vm7 = vcmp.eq.f32.partialorder %v1110_v42, 8.507059e+37  ;;  %v903_v12 = vsub.f32 %v3020_v21, %v3178_v22  ;;  %v1168_v42 = vand.u32 2147483648, %v3170_v0 }
 0x44d   :  { %1023 = vadd.xlane.f32.xlu2 %v1022_v23  ;;  %v1675_v32 = vpop.permute.xlu1 %1674  ;;  %v1128_v23 = vsel %vm1125_vm13, %v1127_v8, %v1123_v33  ;;  %v1104_v33 = vmul.f32 %v2115_v2, %v1103_v7 }
 0x44e   :  { %1743 = vst.msk [vmem:[%s3900_s7 + $0xe0] sm:$0xff] %vm1714_vm3, %v1675_v32  ;;  %v1524_v6 = vmul.f32 %v2986_v29, %v1128_v23  ;;  %v1028_v32 = vsel %vm783_vm2, %v3285_v30, 0.0  ;;  %v1095_v29 = vsel %vm1094_vm0, %v2111_v57, %v1091_v15  ;;  %v1112_v23 = vand.u32 2147483648, %v3058_v38  ;;  %v2117_v38 = vpop.eup %2116 }
 0x44f   :  { %v1105_v5 = vadd.f32 %v2115_v2, %v1104_v33  ;;  %v957_v15 = vmul.f32 1.442695, %v903_v12  ;;  %v1158_v21 = vmul.f32 %v2117_v38, %v3170_v0  ;;  %vm1163_vm9 = vweird.f32 %v2117_v38 }
 0x450   :  { %879 = vmax.xlane.f32.xlu1 %v878_v43  ;;  %v1099_v43 = vor.u32 1.1754944e-38, %v1098_v20  ;;  %vm1134_vm0 = vweird.f32 %v3107_v31 }
 0x451   :  { %v1109_v41 = vsel %vm1108_vm6, %v2115_v2, %v1105_v5  ;;  %2118 = vpow2.f32 %v957_v15  ;;  %v899_v2 = vsub.f32 %v2907_v44, %v3056_v53  ;;  %v901_v53 = vsub.f32 %v2939_v18, %v3109_v34 }
 0x452   :  { %v2201_v34 = vmov 0.0   ;;  %v1169_v15 = vor.u32 1.1754944e-38, %v1168_v42  ;;  %v1140_v42 = vand.u32 2147483648, %v3107_v31  ;;  %vm1148_vm6 = vweird.f32 %v3123_v50 }
 0x453   :  { %v953_v18 = vmul.f32 1.442695, %v901_v53 }
 0x457   :  { %1786 = vrot.lane.b32.xlu0 %v1524_v6, %s2200_s12  ;;  %v1100_v6 = vsel %vm1097_vm1, %v1099_v43, %v1095_v29  ;;  %v3311_v7 = vpop.eup %2118  ;;  %v1159_v43 = vsub.f32 1.0, %v1158_v21 }
 0x458   :  { %1029 = vadd.xlane.f32.xlu1 %v1028_v32  ;;  %v1522_v8 = vmul.f32 %v2893_v54, %v1100_v6  ;;  %v1113_v32 = vor.u32 1.1754944e-38, %v1112_v23  ;;  %v1043_v29 = vsel %vm783_vm2, %v3311_v7, 0.0 }
 0x459   :  { %v1160_v33 = vmul.f32 %v2117_v38, %v1159_v43 }
 0x45a   :  { %v1114_v57 = vsel %vm1111_vm7, %v1113_v32, %v1109_v41 }
 0x45b   :  { %v1523_v54 = vmul.f32 %v2904_v59, %v1114_v57  ;;  %v949_v59 = vmul.f32 1.442695, %v899_v2  ;;  %v1161_v5 = vadd.f32 %v2117_v38, %v1160_v33  ;;  %v1166_v57 = vand.u32 2147483647, %v3170_v0 }
 0x45d   :  { %2120 = vpow2.f32 %v949_v59  ;;  %vm1167_vm13 = vcmp.eq.f32.partialorder %v1166_v57, 8.507059e+37 }
 0x45e   :  { %2122 = vrcp.f32 %v3107_v31 }
 0x45f   :  { %2124 = vpow2.f32 %v953_v18  ;;  %v1141_v18 = vor.u32 1.1754944e-38, %v1140_v42 }
 0x460   :  { %2126 = vrcp.f32 %v3123_v50 }
 0x461   :  { %2128 = vrcp.f32 %v3237_v36 }
 0x463   :  { %v3329_v23 = vpop.eup %2120 }
 0x464   :  { %v2123_v41 = vpop.eup %2122  ;;  %v1031_v12 = vsel %vm783_vm2, %v3329_v23, 0.0 }
 0x465   :  { %1782 = vrot.lane.b32.xlu2 %v1522_v8, %s2200_s12  ;;  %v1130_v0 = vmul.f32 %v2123_v41, %v3107_v31  ;;  %v3351_v33 = vpop.eup %2124  ;;  %vm1135_vm15 = vweird.f32 %v2123_v41 }
 0x466   :  { %v1037_v53 = vsel %vm783_vm2, %v3351_v33, 0.0  ;;  %vm1136_vm1 = vmor %vm1134_vm0, %vm1135_vm15  ;;  %vm1176_vm0 = vweird.f32 %v3168_v40 }
 0x467   :  { %v1131_v59 = vsub.f32 1.0, %v1130_v0 }
 0x469   :  { %v1132_v43 = vmul.f32 %v2123_v41, %v1131_v59  ;;  %v1154_v59 = vand.u32 2147483648, %v3123_v50 }
 0x470   :  { %v3307_v17 = vpop.xlane.xlu0 %875 }
 0x471   :  { %1784 = vrot.lane.b32.xlu1 %v1523_v54, %s2200_s12 }
 0x477   :  { %v3305_v20 = vpop.xlane.xlu2 %1014 }
 0x478   :  { %v3318_v6 = vpop.xlane.xlu0 %1026  ;;  %v3321_v8 = vpop.xlane.xlu1 %869 }
 0x47f   :  { %v3314_v22 = vpop.xlane.xlu2 %872 }
 0x480   :  { %v3346_v2 = vpop.xlane.xlu1 %1020 }
 0x481   :  { %1044 = vadd.xlane.f32.xlu0 %v1043_v29 }
 0x487   :  { %v1679_v44 = vpop.permute.xlu2 %1678 }
 0x488   :  { %1745 = vst.msk [vmem:[%s3900_s7 + $0xf0] sm:$0xff] %vm1714_vm3, %v1679_v44  ;;  %vm1164_vm3 = vmor %vm1162_vm12, %vm1163_vm9  ;;  %v2127_v44 = vpop.eup %2126 }
 0x489   :  { %v1165_v54 = vsel %vm1164_vm3, %v2117_v38, %v1161_v5  ;;  %v1133_v5 = vadd.f32 %v2123_v41, %v1132_v43  ;;  %vm1149_vm5 = vweird.f32 %v2127_v44  ;;  %v906_v43 = vsub.f32 %v3097_v25, %v3248_v14 }
 0x48a   :  { %v1170_v21 = vsel %vm1167_vm13, %v1169_v15, %v1165_v54  ;;  %vm1150_vm7 = vmor %vm1148_vm6, %vm1149_vm5  ;;  %vm1204_vm3 = vweird.f32 %v3237_v36  ;;  %vm1190_vm6 = vweird.f32 %v3196_v4 }
 0x48b   :  { %v1781_v32 = vpop.permute.xlu0 %1780  ;;  %v1527_v29 = vmul.f32 %v3069_v45, %v1170_v21  ;;  %v1144_v45 = vmul.f32 %v2127_v44, %v3123_v50  ;;  %v1137_v57 = vsel %vm1136_vm1, %v2123_v41, %v1133_v5  ;;  %v1155_v41 = vor.u32 1.1754944e-38, %v1154_v59  ;;  %v2129_v5 = vpop.eup %2128 }
 0x48c   :  { %1877 = vst.msk [vmem:[%s3900_s7] sm:$0xff] %vm1876_vm8, %v1781_v32  ;;  %v1138_v32 = vand.u32 2147483647, %v3107_v31  ;;  %vm1205_vm12 = vweird.f32 %v2129_v5  ;;  %v904_v59 = vsub.f32 %v3014_v11, %v3174_v61 }
 0x48d   :  { %1911 = vst.msk [vmem:[%s3900_s7] sm:$0xff] %vm1910_vm11, %v2201_v34  ;;  %vm1206_vm13 = vmor %vm1204_vm3, %vm1205_vm12  ;;  %vm1246_vm3 = vweird.f32 %v3305_v20 }
 0x48e   :  { %1032 = vadd.xlane.f32.xlu2 %v1031_v12  ;;  %v1145_v12 = vsub.f32 1.0, %v1144_v45  ;;  %vm1139_vm4 = vcmp.eq.f32.partialorder %v1138_v32, 8.507059e+37 }
 0x48f   :  { %v1142_v54 = vsel %vm1139_vm4, %v1141_v18, %v1137_v57 }
 0x490   :  { %v1146_v0 = vmul.f32 %v2127_v44, %v1145_v12  ;;  %v1525_v15 = vmul.f32 %v2972_v47, %v1142_v54  ;;  %v1210_v12 = vand.u32 2147483648, %v3237_v36 }
 0x492   :  { %v1147_v21 = vadd.f32 %v2127_v44, %v1146_v0 }
 0x494   :  { %v1151_v31 = vsel %vm1150_vm7, %v2127_v44, %v1147_v21  ;;  %v902_v44 = vsub.f32 %v2984_v55, %v3115_v28  ;;  %v1208_v28 = vand.u32 2147483647, %v3237_v36 }
 0x495   :  { %1792 = vrot.lane.b32.xlu0 %v1527_v29, %s2200_s12  ;;  %v1152_v29 = vand.u32 2147483647, %v3123_v50  ;;  %v1200_v50 = vmul.f32 %v2129_v5, %v3237_v36  ;;  %v1211_v36 = vor.u32 1.1754944e-38, %v1210_v12 }
 0x496   :  { %v955_v32 = vmul.f32 1.442695, %v902_v44 }
 0x497   :  { %vm1153_vm9 = vcmp.eq.f32.partialorder %v1152_v29, 8.507059e+37  ;;  %v1201_v14 = vsub.f32 1.0, %v1200_v50 }
 0x498   :  { %v1681_v38 = vpop.permute.xlu1 %1680 }
 0x499   :  { %1747 = vst.msk [vmem:[%s3900_s7 + $0xf8] sm:$0x3] %vm1746_vm14, %v1681_v38  ;;  %v1156_v38 = vsel %vm1153_vm9, %v1155_v41, %v1151_v31  ;;  %v1202_v57 = vmul.f32 %v2129_v5, %v1201_v14  ;;  %vm1209_vm14 = vcmp.eq.f32.partialorder %v1208_v28, 8.507059e+37  ;;  %v1180_v14 = vand.u32 2147483647, %v3168_v40 }
 0x49a   :  { %v1526_v47 = vmul.f32 %v2997_v56, %v1156_v38 }
 0x49b   :  { %1038 = vadd.xlane.f32.xlu1 %v1037_v53  ;;  %v963_v53 = vmul.f32 1.442695, %v906_v43  ;;  %v1203_v18 = vadd.f32 %v2129_v5, %v1202_v57  ;;  %v959_v43 = vmul.f32 1.442695, %v904_v59  ;;  %vm1181_vm4 = vcmp.eq.f32.partialorder %v1180_v14, 8.507059e+37 }
 0x49c   :  { %v1196_v59 = vand.u32 2147483648, %v3196_v4  ;;  %v1252_v14 = vand.u32 2147483648, %v3305_v20 }
 0x49d   :  { %2130 = vpow2.f32 %v963_v53 }
 0x49e   :  { %2132 = vpow2.f32 %v955_v32 }
 0x49f   :  { %2134 = vrcp.f32 %v3168_v40 }
 0x4a0   :  { %2136 = vpow2.f32 %v959_v43 }
 0x4a1   :  { %2138 = vrcp.f32 %v3196_v4 }
 0x4a2   :  { %2140 = vrcp.f32 %v3305_v20 }
 0x4a3   :  { %v3372_v42 = vpop.eup %2130 }
 0x4a4   :  { %v1052_v25 = vsel %vm783_vm2, %v3372_v42, 0.0  ;;  %v3396_v0 = vpop.eup %2132 }
 0x4a5   :  { %v2135_v21 = vpop.eup %2134  ;;  %v1040_v29 = vsel %vm783_vm2, %v3396_v0, 0.0 }
 0x4a6   :  { %1788 = vrot.lane.b32.xlu2 %v1525_v15, %s2200_s12  ;;  %v1207_v15 = vsel %vm1206_vm13, %v2129_v5, %v1203_v18  ;;  %v1172_v41 = vmul.f32 %v2135_v21, %v3168_v40  ;;  %vm1177_vm15 = vweird.f32 %v2135_v21 }
 0x4a7   :  { %v1212_v31 = vsel %vm1209_vm14, %v1211_v36, %v1207_v15  ;;  %vm1178_vm1 = vmor %vm1176_vm0, %vm1177_vm15  ;;  %v909_v15 = vsub.f32 %v3162_v13, %v3321_v8  ;;  %v1194_v36 = vand.u32 2147483647, %v3196_v4  ;;  %vm1218_vm0 = vweird.f32 %v3189_v3 }
 0x4a8   :  { %v1530_v11 = vmul.f32 %v3136_v39, %v1212_v31  ;;  %v1173_v61 = vsub.f32 1.0, %v1172_v41  ;;  %v1197_v41 = vor.u32 1.1754944e-38, %v1196_v59 }
 0x4a9   :  { %vm1195_vm9 = vcmp.eq.f32.partialorder %v1194_v36, 8.507059e+37 }
 0x4aa   :  { %v1174_v53 = vmul.f32 %v2135_v21, %v1173_v61 }
 0x4ac   :  { %v1175_v50 = vadd.f32 %v2135_v21, %v1174_v53  ;;  %v905_v53 = vsub.f32 %v3065_v27, %v3172_v49 }
 0x4ae   :  { %v1179_v57 = vsel %vm1178_vm1, %v2135_v21, %v1175_v50 }
 0x4b4   :  { %1790 = vrot.lane.b32.xlu1 %v1526_v47, %s2200_s12  ;;  %v3417_v47 = vpop.eup %2136 }
 0x4b5   :  { %v2139_v44 = vpop.eup %2138  ;;  %v1046_v39 = vsel %vm783_vm2, %v3417_v47, 0.0 }
 0x4b6   :  { %v3381_v56 = vpop.xlane.xlu0 %1035  ;;  %v1186_v32 = vmul.f32 %v2139_v44, %v3196_v4  ;;  %vm1191_vm5 = vweird.f32 %v2139_v44  ;;  %v2141_v13 = vpop.eup %2140 }
 0x4b7   :  { %vm1192_vm7 = vmor %vm1190_vm6, %vm1191_vm5  ;;  %vm1247_vm12 = vweird.f32 %v2141_v13  ;;  %vm1232_vm6 = vweird.f32 %v3262_v60 }
 0x4b8   :  { %vm1248_vm13 = vmor %vm1246_vm3, %vm1247_vm12 }
 0x4bf   :  { %1053 = vadd.xlane.f32.xlu0 %v1052_v25  ;;  %v1182_v25 = vand.u32 2147483648, %v3168_v40 }
 0x4c0   :  { %v3379_v45 = vpop.xlane.xlu2 %1023 }
 0x4c1   :  { %v1183_v18 = vor.u32 1.1754944e-38, %v1182_v25 }
 0x4c3   :  { %v3412_v38 = vpop.xlane.xlu1 %879  ;;  %v1184_v12 = vsel %vm1181_vm4, %v1183_v18, %v1179_v57  ;;  %v1250_v57 = vand.u32 2147483647, %v3305_v20  ;;  %v1253_v18 = vor.u32 1.1754944e-38, %v1252_v14  ;;  %v1238_v14 = vand.u32 2147483648, %v3262_v60 }
 0x4c4   :  { %v1528_v40 = vmul.f32 %v3052_v24, %v1184_v12 }
 0x4c5   :  { %vm1251_vm14 = vcmp.eq.f32.partialorder %v1250_v57, 8.507059e+37 }
 0x4c8   :  { %v1783_v54 = vpop.permute.xlu2 %1782 }
 0x4c9   :  { %1878 = vst.msk [vmem:[%s3900_s7 + $0x8] sm:$0xff] %vm1876_vm8, %v1783_v54  ;;  %v1787_v55 = vpop.permute.xlu0 %1786  ;;  %v1187_v54 = vsub.f32 1.0, %v1186_v32 }
 0x4ca   :  { %1912 = vst.msk [vmem:[%s3900_s7 + $0x8] sm:$0xff] %vm1910_vm11, %v2201_v34 }
 0x4cb   :  { %1880 = vst.msk [vmem:[%s3900_s7 + $0x18] sm:$0xff] %vm1876_vm8, %v1787_v55  ;;  %v3419_v5 = vpop.xlane.xlu1 %1029  ;;  %v1188_v28 = vmul.f32 %v2139_v44, %v1187_v54 }
 0x4cc   :  { %1914 = vst.msk [vmem:[%s3900_s7 + $0x18] sm:$0xff] %vm1910_vm11, %v2201_v34 }
 0x4cd   :  { %v1189_v21 = vadd.f32 %v2139_v44, %v1188_v28 }
 0x4cf   :  { %1041 = vadd.xlane.f32.xlu2 %v1040_v29  ;;  %v969_v29 = vmul.f32 1.442695, %v909_v15  ;;  %v1193_v31 = vsel %vm1192_vm7, %v2139_v44, %v1189_v21 }
 0x4d0   :  { %v1198_v24 = vsel %vm1195_vm9, %v1197_v41, %v1193_v31 }
 0x4d1   :  { %2142 = vpow2.f32 %v969_v29  ;;  %v1529_v43 = vmul.f32 %v3083_v62, %v1198_v24  ;;  %v961_v62 = vmul.f32 1.442695, %v905_v53 }
 0x4d3   :  { %1798 = vrot.lane.b32.xlu0 %v1530_v11, %s2200_s12  ;;  %v1242_v11 = vmul.f32 %v2141_v13, %v3305_v20  ;;  %2144 = vpow2.f32 %v961_v62 }
 0x4d4   :  { %2146 = vrcp.f32 %v3189_v3 }
 0x4d5   :  { %v1243_v61 = vsub.f32 1.0, %v1242_v11 }
 0x4d7   :  { %v3446_v8 = vpop.eup %2142  ;;  %v1244_v44 = vmul.f32 %v2141_v13, %v1243_v61 }
 0x4d8   :  { %v1061_v4 = vsel %vm783_vm2, %v3446_v8, 0.0 }
 0x4d9   :  { %v3479_v20 = vpop.eup %2144 }
 0x4da   :  { %v2147_v54 = vpop.eup %2146 }
 0x4db   :  { %v1214_v15 = vmul.f32 %v2147_v54, %v3189_v3  ;;  %vm1219_vm15 = vweird.f32 %v2147_v54 }
 0x4dc   :  { %vm1220_vm1 = vmor %vm1218_vm0, %vm1219_vm15 }
 0x4dd   :  { %v1215_v59 = vsub.f32 1.0, %v1214_v15 }
 0x4de   :  { %1047 = vadd.xlane.f32.xlu1 %v1046_v39  ;;  %v1245_v39 = vadd.f32 %v2141_v13, %v1244_v44 }
 0x4df   :  { %v1216_v36 = vmul.f32 %v2147_v54, %v1215_v59 }
 0x4e0   :  { %v1249_v49 = vsel %vm1248_vm13, %v2141_v13, %v1245_v39 }
 0x4e1   :  { %v1254_v12 = vsel %vm1251_vm14, %v1253_v18, %v1249_v49  ;;  %v1217_v29 = vadd.f32 %v2147_v54, %v1216_v36 }
 0x4e2   :  { %v1533_v28 = vmul.f32 %v3198_v48, %v1254_v12 }
 0x4e3   :  { %v1785_v55 = vpop.permute.xlu1 %1784 }
 0x4e4   :  { %1879 = vst.msk [vmem:[%s3900_s7 + $0x10] sm:$0xff] %vm1876_vm8, %v1785_v55  ;;  %v907_v55 = vsub.f32 %v3094_v16, %v3244_v26  ;;  %v1224_v16 = vand.u32 2147483648, %v3189_v3  ;;  %v1222_v26 = vand.u32 2147483647, %v3189_v3  ;;  %v912_v3 = vsub.f32 %v3231_v10, %v3412_v38 }
 0x4e5   :  { %1913 = vst.msk [vmem:[%s3900_s7 + $0x10] sm:$0xff] %vm1910_vm11, %v2201_v34 }
 0x4e6   :  { %v965_v21 = vmul.f32 1.442695, %v907_v55  ;;  %v1225_v13 = vor.u32 1.1754944e-38, %v1224_v16  ;;  %vm1223_vm4 = vcmp.eq.f32.partialorder %v1222_v26, 8.507059e+37  ;;  %v975_v39 = vmul.f32 1.442695, %v912_v3 }
 0x4e7   :  { %1794 = vrot.lane.b32.xlu2 %v1528_v40, %s2200_s12  ;;  %v1049_v40 = vsel %vm783_vm2, %v3479_v20, 0.0  ;;  %v1294_v16 = vand.u32 2147483648, %v3379_v45 }
 0x4e8   :  { %2148 = vpow2.f32 %v965_v21 }
 0x4e9   :  { %2150 = vrcp.f32 %v3262_v60 }
 0x4ea   :  { %2152 = vrcp.f32 %v3379_v45 }
 0x4eb   :  { %2154 = vpow2.f32 %v975_v39 }
 0x4ee   :  { %v3489_v31 = vpop.eup %2148 }
 0x4ef   :  { %v2151_v41 = vpop.eup %2150  ;;  %v1055_v24 = vsel %vm783_vm2, %v3489_v31, 0.0 }
 0x4f0   :  { %v1228_v11 = vmul.f32 %v2151_v41, %v3262_v60  ;;  %vm1233_vm5 = vweird.f32 %v2151_v41  ;;  %v2153_v49 = vpop.eup %2152 }
 0x4f1   :  { %vm1234_vm7 = vmor %vm1232_vm6, %vm1233_vm5  ;;  %v3517_v10 = vpop.eup %2154  ;;  %v1284_v38 = vmul.f32 %v2153_v49, %v3379_v45  ;;  %vm1289_vm12 = vweird.f32 %v2153_v49 }
 0x4f2   :  { %v1229_v61 = vsub.f32 1.0, %v1228_v11 }
 0x4f4   :  { %v3453_v50 = vpop.xlane.xlu0 %1044  ;;  %v1230_v62 = vmul.f32 %v2151_v41, %v1229_v61 }
 0x4f7   :  { %1796 = vrot.lane.b32.xlu1 %v1529_v43, %s2200_s12  ;;  %v1221_v43 = vsel %vm1220_vm1, %v2147_v54, %v1217_v29  ;;  %v1285_v54 = vsub.f32 1.0, %v1284_v38 }
 0x4f9   :  { %v1286_v15 = vmul.f32 %v2153_v49, %v1285_v54 }
 0x4fd   :  { %1062 = vadd.xlane.f32.xlu0 %v1061_v4  ;;  %v1226_v4 = vsel %vm1223_vm4, %v1225_v13, %v1221_v43 }
 0x4fe   :  { %v1531_v44 = vmul.f32 %v3085_v1, %v1226_v4  ;;  %v1231_v1 = vadd.f32 %v2151_v41, %v1230_v62 }
 0x500   :  { %v1235_v57 = vsel %vm1234_vm7, %v2151_v41, %v1231_v1  ;;  %v1292_v41 = vand.u32 2147483647, %v3379_v45 }
 0x501   :  { %v3455_v25 = vpop.xlane.xlu2 %1032 }
 0x502   :  { %2156 = vrcp.f32 %v3455_v25  ;;  %vm1293_vm13 = vcmp.eq.f32.partialorder %v1292_v41, 8.507059e+37  ;;  %v1336_v61 = vand.u32 2147483648, %v3455_v25  ;;  %vm1330_vm15 = vweird.f32 %v3455_v25 }
 0x503   :  { %v1334_v62 = vand.u32 2147483647, %v3455_v25 }
 0x505   :  { %vm1335_vm1 = vcmp.eq.f32.partialorder %v1334_v62, 8.507059e+37 }
 0x507   :  { %v1793_v32 = vpop.permute.xlu0 %1792 }
 0x508   :  { %1883 = vst.msk [vmem:[%s3900_s7 + $0x30] sm:$0xff] %vm1876_vm8, %v1793_v32  ;;  %v1236_v32 = vand.u32 2147483647, %v3262_v60  ;;  %v1070_v60 = vsel %vm877_vm10, %v3517_v10, 0.0  ;;  %v2157_v55 = vpop.eup %2156  ;;  %vm1288_vm10 = vweird.f32 %v3379_v45 }
 0x509   :  { %1917 = vst.msk [vmem:[%s3900_s7 + $0x30] sm:$0xff] %vm1910_vm11, %v2201_v34  ;;  %v1789_v27 = vpop.permute.xlu2 %1788  ;;  %v1326_v21 = vmul.f32 %v2157_v55, %v3455_v25  ;;  %vm1290_vm3 = vmor %vm1288_vm10, %vm1289_vm12  ;;  %vm1331_vm14 = vweird.f32 %v2157_v55  ;;  %vm1260_vm12 = vweird.f32 %v3250_v35 }
 0x50a   :  { %1881 = vst.msk [vmem:[%s3900_s7 + $0x20] sm:$0xff] %vm1876_vm8, %v1789_v27  ;;  %v1239_v27 = vor.u32 1.1754944e-38, %v1238_v14  ;;  %vm1237_vm9 = vcmp.eq.f32.partialorder %v1236_v32, 8.507059e+37  ;;  %vm1332_vm0 = vmor %vm1330_vm15, %vm1331_vm14  ;;  %v1337_v32 = vor.u32 1.1754944e-38, %v1336_v61  ;;  %v1280_v61 = vand.u32 2147483648, %v3346_v2 }
 0x50b   :  { %1915 = vst.msk [vmem:[%s3900_s7 + $0x20] sm:$0xff] %vm1910_vm11, %v2201_v34  ;;  %v1327_v29 = vsub.f32 1.0, %v1326_v21  ;;  %vm1274_vm14 = vweird.f32 %v3346_v2 }
 0x50c   :  { %v1240_v18 = vsel %vm1237_vm9, %v1239_v27, %v1235_v57 }
 0x50d   :  { %v1532_v12 = vmul.f32 %v3148_v46, %v1240_v18  ;;  %v1287_v46 = vadd.f32 %v2153_v49, %v1286_v15 }
 0x50e   :  { %v3493_v48 = vpop.xlane.xlu1 %1038 }
 0x510   :  { %1050 = vadd.xlane.f32.xlu2 %v1049_v40 }
 0x511   :  { %1804 = vrot.lane.b32.xlu0 %v1533_v28, %s2200_s12  ;;  %v908_v28 = vsub.f32 %v3128_v37, %v3241_v63  ;;  %v1328_v37 = vmul.f32 %v2157_v55, %v1327_v29  ;;  %v1291_v63 = vsel %vm1290_vm3, %v2153_v49, %v1287_v46  ;;  %v910_v49 = vsub.f32 %v3157_v9, %v3314_v22 }
 0x513   :  { %v967_v59 = vmul.f32 1.442695, %v908_v28  ;;  %v1329_v4 = vadd.f32 %v2157_v55, %v1328_v37  ;;  %v971_v54 = vmul.f32 1.442695, %v910_v49  ;;  %v1322_v49 = vand.u32 2147483648, %v3419_v5 }
 0x515   :  { %v1333_v14 = vsel %vm1332_vm0, %v2157_v55, %v1329_v4 }
 0x521   :  { %1056 = vadd.xlane.f32.xlu1 %v1055_v24  ;;  %v1295_v24 = vor.u32 1.1754944e-38, %v1294_v16 }
 0x523   :  { %v1296_v11 = vsel %vm1293_vm13, %v1295_v24, %v1291_v63 }
 0x524   :  { %v1536_v3 = vmul.f32 %v3270_v58, %v1296_v11  ;;  %v1338_v58 = vsel %vm1335_vm1, %v1337_v32, %v1333_v14 }
 0x526   :  { %v1791_v53 = vpop.permute.xlu1 %1790 }
 0x527   :  { %1882 = vst.msk [vmem:[%s3900_s7 + $0x28] sm:$0xff] %vm1876_vm8, %v1791_v53 }
 0x528   :  { %1916 = vst.msk [vmem:[%s3900_s7 + $0x28] sm:$0xff] %vm1910_vm11, %v2201_v34  ;;  %1800 = vrot.lane.b32.xlu2 %v1531_v44, %s2200_s12 }
 0x532   :  { %v3524_v40 = vpop.xlane.xlu0 %1053 }
 0x53a   :  { %1802 = vrot.lane.b32.xlu1 %v1532_v12, %s2200_s12  ;;  %v1539_v12 = vmul.f32 %v3329_v23, %v1338_v58  ;;  %v1264_v23 = vand.u32 2147483647, %v3250_v35 }
 0x53b   :  { %1071 = vadd.xlane.f32.xlu0 %v1070_v60 }
 0x53c   :  { %vm1265_vm3 = vcmp.eq.f32.partialorder %v1264_v23, 8.507059e+37 }
 0x542   :  { %v1042_v36 = vpop.xlane.xlu2 %1041 }
 0x543   :  { %2158 = vrcp.f32 %v1042_v36  ;;  %v1378_v25 = vand.u32 2147483648, %v1042_v36  ;;  %vm1372_vm5 = vweird.f32 %v1042_v36  ;;  %v1376_v60 = vand.u32 2147483647, %v1042_v36 }
 0x544   :  { %2160 = vpow2.f32 %v967_v59  ;;  %v1266_v59 = vand.u32 2147483648, %v3250_v35 }
 0x545   :  { %v1799_v26 = vpop.permute.xlu0 %1798  ;;  %2162 = vrcp.f32 %v3250_v35  ;;  %v1379_v28 = vor.u32 1.1754944e-38, %v1378_v25  ;;  %vm1377_vm7 = vcmp.eq.f32.partialorder %v1376_v60, 8.507059e+37  ;;  %v1323_v60 = vor.u32 1.1754944e-38, %v1322_v49 }
 0x546   :  { %1886 = vst.msk [vmem:[%s3900_s7 + $0x48] sm:$0xff] %vm1876_vm8, %v1799_v26  ;;  %2164 = vpow2.f32 %v971_v54  ;;  %v1267_v26 = vor.u32 1.1754944e-38, %v1266_v59  ;;  %v911_v54 = vsub.f32 %v3187_v52, %v3307_v17  ;;  %v1362_v59 = vand.u32 2147483647, %v3493_v48 }
 0x547   :  { %1920 = vst.msk [vmem:[%s3900_s7 + $0x48] sm:$0xff] %vm1910_vm11, %v2201_v34  ;;  %2166 = vrcp.f32 %v3346_v2 }
 0x548   :  { %2168 = vrcp.f32 %v3419_v5 }
 0x549   :  { %v2159_v43 = vpop.eup %2158  ;;  %2170 = vrcp.f32 %v3493_v48 }
 0x54a   :  { %v1368_v45 = vmul.f32 %v2159_v43, %v1042_v36  ;;  %v1795_v13 = vpop.permute.xlu2 %1794  ;;  %v3552_v44 = vpop.eup %2160  ;;  %vm1373_vm4 = vweird.f32 %v2159_v43 }
 0x54b   :  { %1884 = vst.msk [vmem:[%s3900_s7 + $0x38] sm:$0xff] %vm1876_vm8, %v1795_v13  ;;  %v2163_v39 = vpop.eup %2162  ;;  %v1058_v57 = vsel %vm783_vm2, %v3552_v44, 0.0  ;;  %vm1374_vm6 = vmor %vm1372_vm5, %vm1373_vm4  ;;  %vm1316_vm4 = vweird.f32 %v3419_v5 }
 0x54c   :  { %v1369_v53 = vsub.f32 1.0, %v1368_v45  ;;  %1918 = vst.msk [vmem:[%s3900_s7 + $0x38] sm:$0xff] %vm1910_vm11, %v2201_v34  ;;  %v1256_v27 = vmul.f32 %v2163_v39, %v3250_v35  ;;  %vm1261_vm9 = vweird.f32 %v2163_v39  ;;  %v3571_v36 = vpop.eup %2164 }
 0x54d   :  { %vm1262_vm10 = vmor %vm1260_vm12, %vm1261_vm9  ;;  %v2167_v16 = vpop.eup %2166  ;;  %vm1358_vm9 = vweird.f32 %v3493_v48 }
 0x54e   :  { %v1370_v1 = vmul.f32 %v2159_v43, %v1369_v53  ;;  %v1257_v38 = vsub.f32 1.0, %v1256_v27  ;;  %v1270_v37 = vmul.f32 %v2167_v16, %v3346_v2  ;;  %vm1275_vm13 = vweird.f32 %v2167_v16 }
 0x54f   :  { %1810 = vrot.lane.b32.xlu0 %v1536_v3, %s2200_s12  ;;  %v1278_v53 = vand.u32 2147483647, %v3346_v2  ;;  %vm1276_vm15 = vmor %vm1274_vm14, %vm1275_vm13 }
 0x550   :  { %v1371_v18 = vadd.f32 %v2159_v43, %v1370_v1  ;;  %v1258_v15 = vmul.f32 %v2163_v39, %v1257_v38  ;;  %v1271_v63 = vsub.f32 1.0, %v1270_v37  ;;  %v1281_v1 = vor.u32 1.1754944e-38, %v1280_v61 }
 0x551   :  { %1059 = vadd.xlane.f32.xlu2 %v1058_v57  ;;  %v3573_v29 = vpop.xlane.xlu1 %1047  ;;  %vm1279_vm0 = vcmp.eq.f32.partialorder %v1278_v53, 8.507059e+37 }
 0x552   :  { %v1375_v55 = vsel %vm1374_vm6, %v2159_v43, %v1371_v18  ;;  %v1259_v22 = vadd.f32 %v2163_v39, %v1258_v15  ;;  %v2169_v43 = vpop.eup %2168  ;;  %v1272_v45 = vmul.f32 %v2167_v16, %v1271_v63  ;;  %2172 = vrcp.f32 %v3573_v29 }
 0x553   :  { %v1380_v21 = vsel %vm1377_vm7, %v1379_v28, %v1375_v55  ;;  %v2171_v4 = vpop.eup %2170  ;;  %vm1317_vm1 = vweird.f32 %v2169_v43  ;;  %v1320_v18 = vand.u32 2147483647, %v3419_v5  ;;  %vm1400_vm13 = vweird.f32 %v3573_v29 }
 0x554   :  { %v1542_v9 = vmul.f32 %v3396_v0, %v1380_v21  ;;  %v1263_v46 = vsel %vm1262_vm10, %v2163_v39, %v1259_v22  ;;  %v1064_v0 = vsel %vm783_vm2, %v3571_v36, 0.0  ;;  %v1273_v11 = vadd.f32 %v2167_v16, %v1272_v45  ;;  %vm1318_vm5 = vmor %vm1316_vm4, %vm1317_vm1 }
 0x555   :  { %v1268_v41 = vsel %vm1265_vm3, %v1267_v26, %v1263_v46  ;;  %v1354_v62 = vmul.f32 %v2171_v4, %v3493_v48  ;;  %vm1321_vm6 = vcmp.eq.f32.partialorder %v1320_v18, 8.507059e+37  ;;  %vm1359_vm7 = vweird.f32 %v2171_v4 }
 0x556   :  { %v1534_v35 = vmul.f32 %v3146_v51, %v1268_v41  ;;  %v1312_v51 = vmul.f32 %v2169_v43, %v3419_v5  ;;  %v1277_v39 = vsel %vm1276_vm15, %v2167_v16, %v1273_v11  ;;  %v973_v5 = vmul.f32 1.442695, %v911_v54  ;;  %vm1360_vm12 = vmor %vm1358_vm9, %vm1359_vm7 }
 0x557   :  { %1816 = vrot.lane.b32.xlu0 %v1539_v12, %s2200_s12  ;;  %v1282_v14 = vsel %vm1279_vm0, %v1281_v1, %v1277_v39  ;;  %v1355_v32 = vsub.f32 1.0, %v1354_v62  ;;  %vm1363_vm10 = vcmp.eq.f32.partialorder %v1362_v59, 8.507059e+37  ;;  %v1406_v16 = vand.u32 2147483648, %v3573_v29 }
 0x558   :  { %v1313_v13 = vsub.f32 1.0, %v1312_v51  ;;  %v3597_v27 = vpop.eup %2172  ;;  %v1535_v58 = vmul.f32 %v3217_v19, %v1282_v14  ;;  %v1364_v19 = vand.u32 2147483648, %v3493_v48  ;;  %v1404_v37 = vand.u32 2147483647, %v3573_v29 }
 0x559   :  { %v1356_v25 = vmul.f32 %v2171_v4, %v1355_v32  ;;  %v1396_v38 = vmul.f32 %v3597_v27, %v3573_v29  ;;  %vm1401_vm3 = vweird.f32 %v3597_v27 }
 0x55a   :  { %v1314_v3 = vmul.f32 %v2169_v43, %v1313_v13  ;;  %v1365_v17 = vor.u32 1.1754944e-38, %v1364_v19  ;;  %vm1402_vm14 = vmor %vm1400_vm13, %vm1401_vm3  ;;  %vm1405_vm15 = vcmp.eq.f32.partialorder %v1404_v37, 8.507059e+37 }
 0x55b   :  { %v1397_v28 = vsub.f32 1.0, %v1396_v38  ;;  %v1357_v15 = vadd.f32 %v2171_v4, %v1356_v25 }
 0x55c   :  { %v1315_v57 = vadd.f32 %v2169_v43, %v1314_v3 }
 0x55d   :  { %v1398_v52 = vmul.f32 %v3597_v27, %v1397_v28 }
 0x55e   :  { %v1319_v12 = vsel %vm1318_vm5, %v2169_v43, %v1315_v57 }
 0x55f   :  { %1822 = vrot.lane.b32.xlu0 %v1542_v9, %s2200_s12  ;;  %v1324_v55 = vsel %vm1321_vm6, %v1323_v60, %v1319_v12  ;;  %v1399_v23 = vadd.f32 %v3597_v27, %v1398_v52  ;;  %vm1302_vm6 = vweird.f32 %v3318_v6 }
 0x560   :  { %v1538_v22 = vmul.f32 %v3285_v30, %v1324_v55  ;;  %v1361_v30 = vsel %vm1360_vm12, %v2171_v4, %v1357_v15  ;;  %v1306_v15 = vand.u32 2147483647, %v3318_v6 }
 0x561   :  { %v1366_v48 = vsel %vm1363_vm10, %v1365_v17, %v1361_v30 }
 0x562   :  { %v1541_v41 = vmul.f32 %v3351_v33, %v1366_v48  ;;  %v1403_v33 = vsel %vm1402_vm14, %v3597_v27, %v1399_v23  ;;  %vm1307_vm13 = vcmp.eq.f32.partialorder %v1306_v15, 8.507059e+37 }
 0x564   :  { %1065 = vadd.xlane.f32.xlu1 %v1064_v0 }
 0x569   :  { %v1797_v24 = vpop.permute.xlu1 %1796  ;;  %1806 = vrot.lane.b32.xlu2 %v1534_v35, %s2200_s12 }
 0x56a   :  { %1885 = vst.msk [vmem:[%s3900_s7 + $0x40] sm:$0xff] %vm1876_vm8, %v1797_v24  ;;  %v1407_v24 = vor.u32 1.1754944e-38, %v1406_v16  ;;  %v1350_v16 = vand.u32 2147483648, %v3381_v56 }
 0x56b   :  { %1919 = vst.msk [vmem:[%s3900_s7 + $0x40] sm:$0xff] %vm1910_vm11, %v2201_v34 }
 0x56c   :  { %v1408_v11 = vsel %vm1405_vm15, %v1407_v24, %v1403_v33  ;;  %vm1344_vm15 = vweird.f32 %v3381_v56  ;;  %v1351_v33 = vor.u32 1.1754944e-38, %v1350_v16 }
 0x56d   :  { %v1544_v3 = vmul.f32 %v3417_v47, %v1408_v11  ;;  %v3908_v11 = vld [vmem:[#allocation3_spill] sm:$0xff] }
 0x570   :  { %v3601_v2 = vpop.xlane.xlu0 %1062 }
 0x57d   :  { %1808 = vrot.lane.b32.xlu1 %v1535_v58, %s2200_s12 }
 0x583   :  { %v1051_v21 = vpop.xlane.xlu2 %1050  ;;  %v1805_v9 = vpop.permute.xlu0 %1804 }
 0x584   :  { %2174 = vrcp.f32 %v1051_v21  ;;  %1889 = vst.msk [vmem:[%s3900_s7 + $0x60] sm:$0xff] %vm1876_vm8, %v1805_v9  ;;  %v1420_v43 = vand.u32 2147483648, %v1051_v21  ;;  %v1418_v51 = vand.u32 2147483647, %v1051_v21  ;;  %vm1414_vm1 = vweird.f32 %v1051_v21 }
 0x585   :  { %1923 = vst.msk [vmem:[%s3900_s7 + $0x60] sm:$0xff] %vm1910_vm11, %v2201_v34  ;;  %1814 = vrot.lane.b32.xlu1 %v1538_v22, %s2200_s12  ;;  %2176 = vpow2.f32 %v973_v5 }
 0x586   :  { %2178 = vrcp.f32 %v3318_v6  ;;  %v1421_v53 = vor.u32 1.1754944e-38, %v1420_v43  ;;  %vm1419_vm5 = vcmp.eq.f32.partialorder %v1418_v51, 8.507059e+37 }
 0x587   :  { %2180 = vrcp.f32 %v3381_v56 }
 0x58a   :  { %v2175_v46 = vpop.eup %2174 }
 0x58b   :  { %v1410_v26 = vmul.f32 %v2175_v46, %v1051_v21  ;;  %v1801_v0 = vpop.permute.xlu2 %1800  ;;  %v3636_v35 = vpop.eup %2176  ;;  %vm1415_vm0 = vweird.f32 %v2175_v46 }
 0x58c   :  { %1887 = vst.msk [vmem:[%s3900_s7 + $0x50] sm:$0xff] %vm1876_vm8, %v1801_v0  ;;  %v2179_v29 = vpop.eup %2178  ;;  %v1067_v13 = vsel %vm783_vm2, %v3636_v35, 0.0  ;;  %vm1416_vm4 = vmor %vm1414_vm1, %vm1415_vm0 }
 0x58d   :  { %v1411_v63 = vsub.f32 1.0, %v1410_v26  ;;  %1921 = vst.msk [vmem:[%s3900_s7 + $0x50] sm:$0xff] %vm1910_vm11, %v2201_v34  ;;  %1820 = vrot.lane.b32.xlu1 %v1541_v41, %s2200_s12  ;;  %v1298_v4 = vmul.f32 %v2179_v29, %v3318_v6  ;;  %v2181_v57 = vpop.eup %2180  ;;  %vm1303_vm2 = vweird.f32 %v2179_v29  ;;  %v3907_v26 = vld [vmem:[#allocation2_spill] sm:$0xff]  ;;  %v1348_v41 = vand.u32 2147483647, %v3381_v56 }
 0x58e   :  { %v1340_v49 = vmul.f32 %v2181_v57, %v3381_v56  ;;  %vm3659_vm9 = vmor %vm1302_vm6, %vm1303_vm2  ;;  %vm1345_vm14 = vweird.f32 %v2181_v57 }
 0x58f   :  { %v1412_v45 = vmul.f32 %v2175_v46, %v1411_v63  ;;  %v1299_v14 = vsub.f32 1.0, %v1298_v4  ;;  %vm1346_vm0 = vmor %vm1344_vm15, %vm1345_vm14  ;;  %vm1349_vm1 = vcmp.eq.f32.partialorder %v1348_v41, 8.507059e+37 }
 0x590   :  { %v1341_v25 = vsub.f32 1.0, %v1340_v49  ;;  %v1432_v49 = vand.u32 2147483647, %v3524_v40 }
 0x591   :  { %v1413_v61 = vadd.f32 %v2175_v46, %v1412_v45  ;;  %v1300_v27 = vmul.f32 %v2179_v29, %v1299_v14 }
 0x592   :  { %1068 = vadd.xlane.f32.xlu2 %v1067_v13  ;;  %v1342_v5 = vmul.f32 %v2181_v57, %v1341_v25  ;;  %v1392_v13 = vand.u32 2147483648, %v3453_v50 }
 0x593   :  { %v1417_v62 = vsel %vm1416_vm4, %v2175_v46, %v1413_v61  ;;  %v1301_v18 = vadd.f32 %v2179_v29, %v1300_v27  ;;  %v1390_v61 = vand.u32 2147483647, %v3453_v50  ;;  %v1434_v27 = vand.u32 2147483648, %v3524_v40 }
 0x594   :  { %v1057_v39 = vpop.xlane.xlu1 %1056  ;;  %v1422_v1 = vsel %vm1419_vm5, %v1421_v53, %v1417_v62  ;;  %v1343_v23 = vadd.f32 %v2181_v57, %v1342_v5  ;;  %vm1386_vm5 = vweird.f32 %v3453_v50 }
 0x595   :  { %2182 = vrcp.f32 %v1057_v39  ;;  %1826 = vrot.lane.b32.xlu1 %v1544_v3, %s2200_s12  ;;  %v1545_v32 = vmul.f32 %v3479_v20, %v1422_v1  ;;  %v1308_v20 = vand.u32 2147483648, %v3318_v6  ;;  %v1448_v60 = vand.u32 2147483648, %v1057_v39 }
 0x596   :  { %2184 = vrcp.f32 %v3453_v50  ;;  %v1446_v55 = vand.u32 2147483647, %v1057_v39  ;;  %v1305_v19 = vsel %vm3659_vm9, %v2179_v29, %v1301_v18  ;;  %vm1442_vm12 = vweird.f32 %v1057_v39 }
 0x597   :  { %1828 = vrot.lane.b32.xlu0 %v1545_v32, %s2200_s12  ;;  %2186 = vrcp.f32 %v3524_v40  ;;  %v1309_v22 = vor.u32 1.1754944e-38, %v1308_v20  ;;  %v1449_v59 = vor.u32 1.1754944e-38, %v1448_v60  ;;  %v1347_v63 = vsel %vm1346_vm0, %v2181_v57, %v1343_v23 }
 0x598   :  { %vm1447_vm3 = vcmp.eq.f32.partialorder %v1446_v55, 8.507059e+37  ;;  %2188 = vrcp.f32 %v3601_v2  ;;  %v1352_v24 = vsel %vm1349_vm1, %v1351_v33, %v1347_v63  ;;  %vm1391_vm6 = vcmp.eq.f32.partialorder %v1390_v61, 8.507059e+37 }
 0x599   :  { %v1310_v17 = vsel %vm1307_vm13, %v1309_v22, %v1305_v19  ;;  %v1540_v4 = vmul.f32 %v3908_v11, %v1352_v24  ;;  %vm1428_vm9 = vweird.f32 %v3524_v40  ;;  %v1435_v25 = vor.u32 1.1754944e-38, %v1434_v27 }
 0x59a   :  { %v1537_v0 = vmul.f32 %v3907_v26, %v1310_v17  ;;  %v1476_v60 = vand.u32 2147483648, %v3601_v2  ;;  %vm1470_vm13 = vweird.f32 %v3601_v2 }
 0x59b   :  { %v2183_v58 = vpop.eup %2182 }
 0x59c   :  { %v1438_v47 = vmul.f32 %v2183_v58, %v1057_v39  ;;  %v3655_v12 = vpop.eup %2184  ;;  %vm1443_vm7 = vweird.f32 %v2183_v58  ;;  %v1393_v39 = vor.u32 1.1754944e-38, %v1392_v13  ;;  %v1477_v15 = vor.u32 1.1754944e-38, %v1476_v60 }
 0x59d   :  { %v1382_v21 = vmul.f32 %v3655_v12, %v3453_v50  ;;  %vm1444_vm10 = vmor %vm1442_vm12, %vm1443_vm7  ;;  %v2187_v46 = vpop.eup %2186  ;;  %vm1387_vm4 = vweird.f32 %v3655_v12 }
 0x59e   :  { %v1439_v38 = vsub.f32 1.0, %v1438_v47  ;;  %v2189_v51 = vpop.eup %2188  ;;  %vm1388_vm2 = vmor %vm1386_vm5, %vm1387_vm4  ;;  %vm1429_vm7 = vweird.f32 %v2187_v46 }
 0x59f   :  { %v1383_v6 = vsub.f32 1.0, %v1382_v21  ;;  %v1466_v3 = vmul.f32 %v2189_v51, %v3601_v2  ;;  %vm1430_vm12 = vmor %vm1428_vm9, %vm1429_vm7 }
 0x5a0   :  { %v1440_v54 = vmul.f32 %v2183_v58, %v1439_v38 }
 0x5a1   :  { %v1384_v37 = vmul.f32 %v3655_v12, %v1383_v6  ;;  %v1467_v14 = vsub.f32 1.0, %v1466_v3 }
 0x5a2   :  { %v1441_v9 = vadd.f32 %v2183_v58, %v1440_v54 }
 0x5a3   :  { %v1385_v45 = vadd.f32 %v3655_v12, %v1384_v37 }
 0x5a4   :  { %v1445_v52 = vsel %vm1444_vm10, %v2183_v58, %v1441_v9  ;;  %v1468_v58 = vmul.f32 %v2189_v51, %v1467_v14  ;;  %vm1433_vm10 = vcmp.eq.f32.partialorder %v1432_v49, 8.507059e+37 }
 0x5a5   :  { %v1450_v30 = vsel %vm1447_vm3, %v1449_v59, %v1445_v52  ;;  %v1389_v62 = vsel %vm1388_vm2, %v3655_v12, %v1385_v45  ;;  %vm1471_vm3 = vweird.f32 %v2189_v51 }
 0x5a6   :  { %v1547_v48 = vmul.f32 %v3489_v31, %v1450_v30  ;;  %v1424_v31 = vmul.f32 %v2187_v46, %v3524_v40  ;;  %v1394_v1 = vsel %vm1391_vm6, %v1393_v39, %v1389_v62  ;;  %v1469_v20 = vadd.f32 %v2189_v51, %v1468_v58  ;;  %vm1472_vm14 = vmor %vm1470_vm13, %vm1471_vm3 }
 0x5a7   :  { %v1543_v50 = vmul.f32 %v3311_v7, %v1394_v1  ;;  %v1474_v40 = vand.u32 2147483647, %v3601_v2 }
 0x5a8   :  { %1832 = vrot.lane.b32.xlu1 %v1547_v48, %s2200_s12  ;;  %v1425_v56 = vsub.f32 1.0, %v1424_v31  ;;  %v1473_v28 = vsel %vm1472_vm14, %v2189_v51, %v1469_v20 }
 0x5a9   :  { %vm1475_vm15 = vcmp.eq.f32.partialorder %v1474_v40, 8.507059e+37 }
 0x5aa   :  { %1812 = vrot.lane.b32.xlu2 %v1537_v0, %s2200_s12  ;;  %v1426_v53 = vmul.f32 %v2187_v46, %v1425_v56  ;;  %v1478_v2 = vsel %vm1475_vm15, %v1477_v15, %v1473_v28 }
 0x5ab   :  { %v1549_v21 = vmul.f32 %v3446_v8, %v1478_v2 }
 0x5ac   :  { %v1803_v29 = vpop.permute.xlu1 %1802  ;;  %v1427_v32 = vadd.f32 %v2187_v46, %v1426_v53 }
 0x5ad   :  { %1888 = vst.msk [vmem:[%s3900_s7 + $0x58] sm:$0xff] %vm1876_vm8, %v1803_v29 }
 0x5ae   :  { %1922 = vst.msk [vmem:[%s3900_s7 + $0x58] sm:$0xff] %vm1910_vm11, %v2201_v34  ;;  %v3688_v43 = vpop.xlane.xlu0 %1071  ;;  %v1431_v18 = vsel %vm1430_vm12, %v2187_v46, %v1427_v32 }
 0x5af   :  { %2190 = vrcp.f32 %v3688_v43  ;;  %v1436_v38 = vsel %vm1433_vm10, %v1435_v25, %v1431_v18  ;;  %v1518_v5 = vand.u32 2147483648, %v3688_v43  ;;  %vm1512_vm1 = vweird.f32 %v3688_v43 }
 0x5b0   :  { %v1546_v7 = vmul.f32 %v3372_v42, %v1436_v38  ;;  %v1516_v9 = vand.u32 2147483647, %v3688_v43 }
 0x5b1   :  { %v1519_v30 = vor.u32 1.1754944e-38, %v1518_v5 }
 0x5b2   :  { %1818 = vrot.lane.b32.xlu2 %v1540_v4, %s2200_s12  ;;  %vm1517_vm5 = vcmp.eq.f32.partialorder %v1516_v9, 8.507059e+37 }
 0x5b5   :  { %v2191_v57 = vpop.eup %2190 }
 0x5b6   :  { %v1508_v47 = vmul.f32 %v2191_v57, %v3688_v43  ;;  %vm1513_vm0 = vweird.f32 %v2191_v57 }
 0x5b7   :  { %vm1514_vm4 = vmor %vm1512_vm1, %vm1513_vm0 }
 0x5b8   :  { %v1509_v12 = vsub.f32 1.0, %v1508_v47 }
 0x5ba   :  { %1824 = vrot.lane.b32.xlu2 %v1543_v50, %s2200_s12  ;;  %v1510_v55 = vmul.f32 %v2191_v57, %v1509_v12 }
 0x5bc   :  { %v1511_v19 = vadd.f32 %v2191_v57, %v1510_v55 }
 0x5be   :  { %v1515_v59 = vsel %vm1514_vm4, %v2191_v57, %v1511_v19  ;;  %vm1908_vm4 = vcmask 779904  }
 0x5bf   :  { %v1520_v6 = vsel %vm1517_vm5, %v1519_v30, %v1515_v59  ;;  %vm1942_vm5 = vcmask 1042176  }
 0x5c0   :  { %v1552_v16 = vmul.f32 %v3517_v10, %v1520_v6 }
 0x5c1   :  { %v1811_v54 = vpop.permute.xlu0 %1810 }
 0x5c2   :  { %1892 = vst.msk [vmem:[%s3900_s7 + $0x78] sm:$0xff] %vm1876_vm8, %v1811_v54  ;;  %1830 = vrot.lane.b32.xlu2 %v1546_v7, %s2200_s12 }
 0x5c3   :  { %1926 = vst.msk [vmem:[%s3900_s7 + $0x78] sm:$0xff] %vm1910_vm11, %v2201_v34 }
 0x5c4   :  { %v1060_v42 = vpop.xlane.xlu2 %1059 }
 0x5c5   :  { %2192 = vrcp.f32 %v1060_v42  ;;  %v1462_v23 = vand.u32 2147483648, %v1060_v42  ;;  %v1460_v26 = vand.u32 2147483647, %v1060_v42  ;;  %vm1456_vm6 = vweird.f32 %v1060_v42 }
 0x5c7   :  { %v1463_v37 = vor.u32 1.1754944e-38, %v1462_v23  ;;  %vm1461_vm9 = vcmp.eq.f32.partialorder %v1460_v26, 8.507059e+37 }
 0x5c9   :  { %v1817_v22 = vpop.permute.xlu0 %1816 }
 0x5ca   :  { %1895 = vst.msk [vmem:[%s3900_s7 + $0x90] sm:$0xff] %vm1876_vm8, %v1817_v22  ;;  %1836 = vrot.lane.b32.xlu2 %v1549_v21, %s2200_s12 }
 0x5cb   :  { %v2193_v52 = vpop.eup %2192  ;;  %1929 = vst.msk [vmem:[%s3900_s7 + $0x90] sm:$0xff] %vm1910_vm11, %v2201_v34 }
 0x5cc   :  { %v1452_v8 = vmul.f32 %v2193_v52, %v1060_v42  ;;  %v1807_v17 = vpop.permute.xlu2 %1806  ;;  %vm1457_vm2 = vweird.f32 %v2193_v52 }
 0x5cd   :  { %1890 = vst.msk [vmem:[%s3900_s7 + $0x68] sm:$0xff] %vm1876_vm8, %v1807_v17  ;;  %vm1458_vm7 = vmor %vm1456_vm6, %vm1457_vm2 }
 0x5ce   :  { %v1453_v48 = vsub.f32 1.0, %v1452_v8  ;;  %1924 = vst.msk [vmem:[%s3900_s7 + $0x68] sm:$0xff] %vm1910_vm11, %v2201_v34 }
 0x5d0   :  { %v1454_v46 = vmul.f32 %v2193_v52, %v1453_v48 }
 0x5d1   :  { %v1823_v0 = vpop.permute.xlu0 %1822 }
 0x5d2   :  { %1898 = vst.msk [vmem:[%s3900_s7 + $0xa8] sm:$0xff] %vm1876_vm8, %v1823_v0  ;;  %1842 = vrot.lane.b32.xlu2 %v1552_v16, %s2200_s12  ;;  %v1455_v41 = vadd.f32 %v2193_v52, %v1454_v46 }
 0x5d3   :  { %1932 = vst.msk [vmem:[%s3900_s7 + $0xa8] sm:$0xff] %vm1910_vm11, %v2201_v34 }
 0x5d4   :  { %v1459_v10 = vsel %vm1458_vm7, %v2193_v52, %v1455_v41 }
 0x5d5   :  { %v1464_v31 = vsel %vm1461_vm9, %v1463_v37, %v1459_v10 }
 0x5d6   :  { %v1548_v63 = vmul.f32 %v3552_v44, %v1464_v31 }
 0x5d7   :  { %v1066_v33 = vpop.xlane.xlu1 %1065 }
 0x5d8   :  { %2194 = vrcp.f32 %v1066_v33  ;;  %1834 = vrot.lane.b32.xlu0 %v1548_v63, %s2200_s12  ;;  %v1490_v43 = vand.u32 2147483648, %v1066_v33  ;;  %v1488_v51 = vand.u32 2147483647, %v1066_v33  ;;  %vm1484_vm10 = vweird.f32 %v1066_v33 }
 0x5da   :  { %v1491_v11 = vor.u32 1.1754944e-38, %v1490_v43  ;;  %vm1489_vm13 = vcmp.eq.f32.partialorder %v1488_v51, 8.507059e+37 }
 0x5de   :  { %v2195_v29 = vpop.eup %2194 }
 0x5df   :  { %v1480_v24 = vmul.f32 %v2195_v29, %v1066_v33  ;;  %vm1485_vm12 = vweird.f32 %v2195_v29 }
 0x5e0   :  { %vm1486_vm3 = vmor %vm1484_vm10, %vm1485_vm12 }
 0x5e1   :  { %v1481_v56 = vsub.f32 1.0, %v1480_v24 }
 0x5e3   :  { %v1482_v45 = vmul.f32 %v2195_v29, %v1481_v56 }
 0x5e5   :  { %v1483_v13 = vadd.f32 %v2195_v29, %v1482_v45 }
 0x5e7   :  { %v1487_v4 = vsel %vm1486_vm3, %v2195_v29, %v1483_v13 }
 0x5e8   :  { %v1492_v61 = vsel %vm1489_vm13, %v1491_v11, %v1487_v4 }
 0x5e9   :  { %v1550_v44 = vmul.f32 %v3571_v36, %v1492_v61 }
 0x5eb   :  { %1838 = vrot.lane.b32.xlu1 %v1550_v44, %s2200_s12 }
 0x5ef   :  { %v1809_v53 = vpop.permute.xlu1 %1808 }
 0x5f0   :  { %1891 = vst.msk [vmem:[%s3900_s7 + $0x70] sm:$0xff] %vm1876_vm8, %v1809_v53 }
 0x5f1   :  { %1925 = vst.msk [vmem:[%s3900_s7 + $0x70] sm:$0xff] %vm1910_vm11, %v2201_v34 }
 0x5f7   :  { %v1815_v3 = vpop.permute.xlu1 %1814 }
 0x5f8   :  { %1894 = vst.msk [vmem:[%s3900_s7 + $0x88] sm:$0xff] %vm1876_vm8, %v1815_v3 }
 0x5f9   :  { %1928 = vst.msk [vmem:[%s3900_s7 + $0x88] sm:$0xff] %vm1910_vm11, %v2201_v34 }
 0x5ff   :  { %v1821_v36 = vpop.permute.xlu1 %1820 }
 0x600   :  { %1897 = vst.msk [vmem:[%s3900_s7 + $0xa0] sm:$0xff] %vm1876_vm8, %v1821_v36 }
 0x601   :  { %1931 = vst.msk [vmem:[%s3900_s7 + $0xa0] sm:$0xff] %vm1910_vm11, %v2201_v34 }
 0x605   :  { %v1069_v62 = vpop.xlane.xlu2 %1068 }
 0x606   :  { %2196 = vrcp.f32 %v1069_v62  ;;  %v1504_v50 = vand.u32 2147483648, %v1069_v62  ;;  %v1502_v58 = vand.u32 2147483647, %v1069_v62  ;;  %vm1498_vm15 = vweird.f32 %v1069_v62 }
 0x607   :  { %v1827_v39 = vpop.permute.xlu1 %1826 }
 0x608   :  { %1900 = vst.msk [vmem:[%s3900_s7 + $0xb8] sm:$0xff] %vm1876_vm8, %v1827_v39  ;;  %v1505_v18 = vor.u32 1.1754944e-38, %v1504_v50  ;;  %vm1503_vm1 = vcmp.eq.f32.partialorder %v1502_v58, 8.507059e+37 }
 0x609   :  { %1934 = vst.msk [vmem:[%s3900_s7 + $0xb8] sm:$0xff] %vm1910_vm11, %v2201_v34  ;;  %v1829_v1 = vpop.permute.xlu0 %1828 }
 0x60a   :  { %1901 = vst.msk [vmem:[%s3900_s7 + $0xc0] sm:$0xff] %vm1876_vm8, %v1829_v1 }
 0x60b   :  { %1935 = vst.msk [vmem:[%s3900_s7 + $0xc0] sm:$0xff] %vm1910_vm11, %v2201_v34 }
 0x60c   :  { %v2197_v14 = vpop.eup %2196 }
 0x60d   :  { %v1494_v32 = vmul.f32 %v2197_v14, %v1069_v62  ;;  %v1813_v57 = vpop.permute.xlu2 %1812  ;;  %vm1499_vm14 = vweird.f32 %v2197_v14 }
 0x60e   :  { %1893 = vst.msk [vmem:[%s3900_s7 + $0x80] sm:$0xff] %vm1876_vm8, %v1813_v57  ;;  %vm1500_vm0 = vmor %vm1498_vm15, %vm1499_vm14 }
 0x60f   :  { %v1495_v27 = vsub.f32 1.0, %v1494_v32  ;;  %1927 = vst.msk [vmem:[%s3900_s7 + $0x80] sm:$0xff] %vm1910_vm11, %v2201_v34 }
 0x611   :  { %v1496_v49 = vmul.f32 %v2197_v14, %v1495_v27 }
 0x613   :  { %v1497_v47 = vadd.f32 %v2197_v14, %v1496_v49 }
 0x615   :  { %v1819_v25 = vpop.permute.xlu2 %1818  ;;  %v1501_v38 = vsel %vm1500_vm0, %v2197_v14, %v1497_v47 }
 0x616   :  { %1896 = vst.msk [vmem:[%s3900_s7 + $0x98] sm:$0xff] %vm1876_vm8, %v1819_v25  ;;  %v1506_v12 = vsel %vm1503_vm1, %v1505_v18, %v1501_v38 }
 0x617   :  { %1930 = vst.msk [vmem:[%s3900_s7 + $0x98] sm:$0xff] %vm1910_vm11, %v2201_v34  ;;  %v1551_v20 = vmul.f32 %v3636_v35, %v1506_v12 }
 0x619   :  { %1840 = vrot.lane.b32.xlu0 %v1551_v20, %s2200_s12 }
 0x61a   :  { %v1833_v60 = vpop.permute.xlu1 %1832 }
 0x61b   :  { %1903 = vst.msk [vmem:[%s3900_s7 + $0xd0] sm:$0xff] %vm1876_vm8, %v1833_v60 }
 0x61c   :  { %1937 = vst.msk [vmem:[%s3900_s7 + $0xd0] sm:$0xff] %vm1910_vm11, %v2201_v34 }
 0x61d   :  { %v1825_v7 = vpop.permute.xlu2 %1824 }
 0x61e   :  { %1899 = vst.msk [vmem:[%s3900_s7 + $0xb0] sm:$0xff] %vm1876_vm8, %v1825_v7 }
 0x61f   :  { %1933 = vst.msk [vmem:[%s3900_s7 + $0xb0] sm:$0xff] %vm1910_vm11, %v2201_v34 }
 0x625   :  { %v1831_v35 = vpop.permute.xlu2 %1830 }
 0x626   :  { %1902 = vst.msk [vmem:[%s3900_s7 + $0xc8] sm:$0xff] %vm1876_vm8, %v1831_v35 }
 0x627   :  { %1936 = vst.msk [vmem:[%s3900_s7 + $0xc8] sm:$0xff] %vm1910_vm11, %v2201_v34 }
 0x62d   :  { %v1837_v40 = vpop.permute.xlu2 %1836 }
 0x62e   :  { %1905 = vst.msk [vmem:[%s3900_s7 + $0xe0] sm:$0xff] %vm1876_vm8, %v1837_v40 }
 0x62f   :  { %1939 = vst.msk [vmem:[%s3900_s7 + $0xe0] sm:$0xff] %vm1910_vm11, %v2201_v34 }
 0x635   :  { %v1843_v54 = vpop.permute.xlu2 %1842 }
 0x636   :  { %1909 = vst.msk [vmem:[%s3900_s7 + $0xf8] sm:$0x3] %vm1908_vm4, %v1843_v54 }
 0x637   :  { %1943 = vst.msk [vmem:[%s3900_s7 + $0xf8] sm:$0x3] %vm1942_vm5, %v2201_v34 }
 0x64a   :  { %v1835_v55 = vpop.permute.xlu0 %1834 }
 0x64b   :  { %1904 = vst.msk [vmem:[%s3900_s7 + $0xd8] sm:$0xff] %vm1876_vm8, %v1835_v55 }
 0x64c   :  { %1938 = vst.msk [vmem:[%s3900_s7 + $0xd8] sm:$0xff] %vm1910_vm11, %v2201_v34 }
 0x65d   :  { %v1839_v28 = vpop.permute.xlu1 %1838 }
 0x65e   :  { %1906 = vst.msk [vmem:[%s3900_s7 + $0xe8] sm:$0xff] %vm1876_vm8, %v1839_v28 }
 0x65f   :  { %1940 = vst.msk [vmem:[%s3900_s7 + $0xe8] sm:$0xff] %vm1910_vm11, %v2201_v34 }
 0x68b   :  { %v1841_v15 = vpop.permute.xlu0 %1840 }
 0x68c   :  { %1907 = vst.msk [vmem:[%s3900_s7 + $0xf0] sm:$0xff] %vm1876_vm8, %v1841_v15 }
 0x68d   :  { %1941 = vst.msk [vmem:[%s3900_s7 + $0xf0] sm:$0xff] %vm1910_vm11, %v2201_v34 }

</bundles_post_ra>
